<compile_context>
chip_gen: v6e
topology: v6e:2x2x1
jax: 0.10.0
libtpu: 0.0.40
codegen_flags: <defaults>
</compile_context>

<pallas_src>
import functools
import math

import numpy as np
import jax
import jax.numpy as jnp
from jax.experimental import pallas as pl
from jax.experimental.pallas import tpu as pltpu


def _encoder_sa_kernel(x_ref,        # (bb*N, C)   bf16 position-major rows
                       wqk_ref,      # (C, 128+C8) bf16  [Wq | 0 | Wk]
                       bqk_ref,      # (1, 128+C8) f32
                       wv_ref,       # (C, C)      bf16  gamma pre-folded
                       bv_ref,       # (1, C)      f32   gamma pre-folded
                       wlin_ref,     # (C, D)      bf16
                       blin_ref,     # (1, D)      f32
                       bnscale_ref,  # (N, D)      f32   gamma_bn/sqrt(var+eps)
                       bnshift_ref,  # (N, D)      f32   beta_bn - mean*scale
                       out_ref,      # (bb*N, D)   f32
                       *, n_pos, c8):
  """One grid step = `bb` batch elements (bb*n_pos position-major rows)."""
  x = x_ref[...]                                   # (bb*N, C) bf16
  bb = x.shape[0] // n_pos

  # ---- fused q/k projection: ONE (bb*N, C) matmul, f32 accumulation.
  # k sits in its own 128-lane group so both slices below are lane-aligned.
  qk = (jnp.dot(x, wqk_ref[...], preferred_element_type=jnp.float32)
        + bqk_ref[...])                            # (bb*N, 128+C8)

  # ---- per-batch self-attention over spatial positions (bb is 1 or 2,
  # statically unrolled).
  attns = []
  for b in range(bb):
    qk_b = qk[b * n_pos:(b + 1) * n_pos]
    q = qk_b[:, :c8]                               # lanes [0, c8)
    k = qk_b[:, 128:128 + c8]                      # lanes [128, 128+c8)
    energy = jax.lax.dot_general(                  # q @ k.T  -> (N, N) f32
        q, k, (((1,), (1,)), ((), ())), preferred_element_type=jnp.float32)
    e_max = jnp.max(energy, axis=-1, keepdims=True)
    p = jnp.exp(energy - e_max)
    inv = pl.reciprocal(jnp.sum(p, axis=-1, keepdims=True), approx=True)
    attns.append(p * inv)                          # softmax(dim=-1)

  # ---- value projection issued AFTER the softmax (v not live across it).
  # gamma is already folded into wv / bv in the wrapper.
  v = (jnp.dot(x, wv_ref[...], preferred_element_type=jnp.float32)
       + bv_ref[...])                              # (bb*N, C) f32

  sa_rows = [
      jnp.dot(attns[b], v[b * n_pos:(b + 1) * n_pos],
              preferred_element_type=jnp.float32)
      for b in range(bb)
  ]
  sa = sa_rows[0] if bb == 1 else jnp.concatenate(sa_rows, axis=0)
  res = sa + x.astype(jnp.float32)                 # gamma*attn_out + x

  # ---- Linear -> ReLU -> BatchNorm1d(N) (eval mode, folded scale/shift),
  # as ONE (bb*N, C) @ (C, D) matmul.
  lin = (jnp.dot(res.astype(jnp.bfloat16), wlin_ref[...],
                 preferred_element_type=jnp.float32) + blin_ref[...])
  act = jnp.maximum(lin, 0.0)

  bn_s = bnscale_ref[...]                          # (N, D) lane-dense
  bn_b = bnshift_ref[...]
  for b in range(bb):
    out_ref[b * n_pos:(b + 1) * n_pos, :] = (
        act[b * n_pos:(b + 1) * n_pos] * bn_s + bn_b)


def _default_batch_block(batch):
  """v7x has 2 TensorCores/chip -> keep a per-batch 'parallel' grid so both
  cores get work.  Single-TC parts (v5e/v6e): the grid is a serial loop, so
  collapse it and merge batch into the matmul M dimension (removes ~0.35us
  per-step overhead and doubles MXU row utilisation on the weight matmuls)."""
  try:
    kind = jax.devices()[0].device_kind.lower()
  except Exception:
    kind = ""
  if "v7" in kind or "7x" in kind:
    return 1
  return batch


def aesthetic_encoder_sa_forward(params, factual_feat, aesthetic_feat,
                                 *, batch_block=None):
  """factual_feat / aesthetic_feat: (B, C/2, H, W) backbone feature maps."""
  B, C_half, H, W = factual_feat.shape
  C = 2 * C_half
  N = H * W
  D = params['w_lin'].shape[0]
  C8 = params['wq'].shape[0]
  QKW = 128 + C8                       # q in lanes [0,C8), k in [128,128+C8)

  if batch_block is None:
    batch_block = _default_batch_block(B)
  BB = batch_block
  assert B % BB == 0

  # Position-major bf16 activations; the concat + reshape + transpose + cast
  # is one chained expression so XLA fuses it into a single copy under jit.
  x_nc = (jnp.transpose(
              jnp.concatenate([factual_feat, aesthetic_feat], axis=1)
              .reshape(B, C, N), (0, 2, 1))
          .reshape(B * N, C)
          .astype(jnp.bfloat16))

  # ---- wrapper-side precompute (batch-invariant, hoisted out of kernel) ----
  gamma = params['gamma'][0]
  w_qk = jnp.zeros((C, QKW), jnp.float32)
  w_qk = w_qk.at[:, :C8].set(params['wq'].T)
  w_qk = w_qk.at[:, 128:128 + C8].set(params['wk'].T)
  w_qk = w_qk.astype(jnp.bfloat16)
  b_qk = jnp.zeros((1, QKW), jnp.float32)
  b_qk = b_qk.at[0, :C8].set(params['bq'])
  b_qk = b_qk.at[0, 128:128 + C8].set(params['bk'])
  # gamma*(attn @ v) == attn @ (x @ (gamma*Wv) + gamma*bv): fold gamma here.
  w_v = (gamma * params['wv'].T).astype(jnp.bfloat16)            # (C, C)
  b_v = (gamma * params['bv']).reshape(1, C).astype(jnp.float32)
  w_lin = params['w_lin'].T.astype(jnp.bfloat16)                 # (C, D)
  b_lin = params['b_lin'].reshape(1, D).astype(jnp.float32)
  bn_scale = params['bn_weight'] / jnp.sqrt(params['bn_var'] + 1e-5)   # (N,)
  bn_shift = params['bn_bias'] - params['bn_mean'] * bn_scale
  bn_scale = jnp.broadcast_to(bn_scale.reshape(N, 1), (N, D)).astype(jnp.float32)
  bn_shift = jnp.broadcast_to(bn_shift.reshape(N, 1), (N, D)).astype(jnp.float32)

  weights = [w_qk, b_qk, w_v, b_v, w_lin, b_lin, bn_scale, bn_shift]

  def _full_spec(a):
    nd = a.ndim
    return pl.BlockSpec(a.shape, lambda i, _nd=nd: (0,) * _nd)

  kernel = functools.partial(_encoder_sa_kernel, n_pos=N, c8=C8)

  # NOTE(scaling): the whole (N, N) attention matrix and all weights are
  # resident per grid step (< 2 MiB at N=64).  If the backbones ever produce
  # much larger maps (N >~ 1.5-2K) this needs a KV-tiled (flash-style)
  # attention path / raised vmem_limit_bytes, especially on v7x (64 MiB VMEM).
  out_flat = pl.pallas_call(
      kernel,
      out_shape=jax.ShapeDtypeStruct((B * N, D), jnp.float32),
      grid_spec=pltpu.PrefetchScalarGridSpec(
          num_scalar_prefetch=0,
          grid=(B // BB,),
          in_specs=[pl.BlockSpec((BB * N, C), lambda i: (i, 0))]
                   + [_full_spec(w) for w in weights],
          out_specs=pl.BlockSpec((BB * N, D), lambda i: (i, 0)),
      ),
      compiler_params=pltpu.CompilerParams(
          dimension_semantics=("parallel",)),
  )(x_nc, *weights)
  return out_flat.reshape(B, N, D)


def reference_forward(params, factual_feat, aesthetic_feat):
  """Pure-JAX mirror of the PyTorch forward (eval-mode BN)."""
  x = jnp.concatenate([factual_feat, aesthetic_feat], axis=1)    # (B, C, H, W)
  B, C, H, W = x.shape
  N = H * W

  def conv1x1(w, b, x):
    return jnp.einsum('oc,bchw->bohw', w, x) + b[None, :, None, None]

  q = conv1x1(params['wq'], params['bq'], x).reshape(B, -1, N)
  q = jnp.transpose(q, (0, 2, 1))                                # (B, N, C8)
  k = conv1x1(params['wk'], params['bk'], x).reshape(B, -1, N)   # (B, C8, N)
  energy = jnp.einsum('bnc,bcm->bnm', q, k)                      # (B, N, N)
  attn = jax.nn.softmax(energy, axis=-1)
  v = conv1x1(params['wv'], params['bv'], x).reshape(B, C, N)    # (B, C, N)
  out = jnp.einsum('bcn,bmn->bcm', v, attn)                      # (B, C, N)
  out = params['gamma'][0] * out + x.reshape(B, C, N)
  out = jnp.transpose(out, (0, 2, 1))                            # (B, N, C)
  lin = out @ params['w_lin'].T + params['b_lin']
  act = jnp.maximum(lin, 0.0)
  scale = params['bn_weight'] / jnp.sqrt(params['bn_var'] + 1e-5)
  shift = params['bn_bias'] - params['bn_mean'] * scale
  return act * scale[None, :, None] + shift[None, :, None]


def init_params(key, C, N, D):
  C8 = C // 8
  ks = jax.random.split(key, 8)

  def lin_init(k, out_f, in_f):
    bound = 1.0 / math.sqrt(in_f)
    kw, kb = jax.random.split(k)
    w = jax.random.uniform(kw, (out_f, in_f), jnp.float32, -bound, bound)
    b = jax.random.uniform(kb, (out_f,), jnp.float32, -bound, bound)
    return w, b

  p = {}
  p['wq'], p['bq'] = lin_init(ks[0], C8, C)      # query_conv (1x1)
  p['wk'], p['bk'] = lin_init(ks[1], C8, C)      # key_conv   (1x1)
  p['wv'], p['bv'] = lin_init(ks[2], C, C)       # value_conv (1x1)
  # PyTorch initializes gamma to 0; use a nonzero value so the attention
  # branch is actually exercised by the numeric check.
  p['gamma'] = jnp.array([0.5], jnp.float32)
  p['w_lin'], p['b_lin'] = lin_init(ks[3], D, C)
  p['bn_weight'] = jax.random.uniform(ks[4], (N,), jnp.float32, 0.5, 1.5)
  p['bn_bias'] = jax.random.normal(ks[5], (N,), jnp.float32) * 0.1
  p['bn_mean'] = jax.random.normal(ks[6], (N,), jnp.float32) * 0.1
  p['bn_var'] = jax.random.uniform(ks[7], (N,), jnp.float32, 0.5, 1.5)
  return p


if __name__ == "__main__":
  key = jax.random.PRNGKey(0)
  k_param, k_f, k_a = jax.random.split(key, 3)

  # Small shapes consistent with the module: two backbone feature maps of
  # (B, C/2, 8, 8); N = 8*8 = 64 matches BatchNorm1d(64); decoder_dim = 128.
  B, C_half, Hs, Ws, D = 2, 128, 8, 8, 128
  C = 2 * C_half
  N = Hs * Ws

  params = init_params(k_param, C, N, D)
  factual_feat = jax.random.normal(k_f, (B, C_half, Hs, Ws), jnp.float32)
  aesthetic_feat = jax.random.normal(k_a, (B, C_half, Hs, Ws), jnp.float32)

  out = jax.jit(aesthetic_encoder_sa_forward)(params, factual_feat,
                                              aesthetic_feat)
  jax.block_until_ready(out)

  # Reference at high precision; kernel uses bf16 operands (f32 accumulation),
  # so the tolerance is set for bf16-level operand rounding.
  with jax.default_matmul_precision("highest"):
    ref = reference_forward(params, factual_feat, aesthetic_feat)
  np.testing.assert_allclose(np.asarray(out), np.asarray(ref),
                             rtol=8e-2, atol=8e-2)
  print("KERNEL_OK")
</pallas_src>

<mosaic_0001>
module attributes {stable_mosaic.version = 11 : i64} {
  func.func @_encoder_sa_kernel(%arg0: i32, %arg1: memref<128x256xbf16, #tpu.memory_space<vmem>>, %arg2: memref<256x160xbf16, #tpu.memory_space<vmem>>, %arg3: memref<1x160xf32, #tpu.memory_space<vmem>>, %arg4: memref<256x256xbf16, #tpu.memory_space<vmem>>, %arg5: memref<1x256xf32, #tpu.memory_space<vmem>>, %arg6: memref<256x128xbf16, #tpu.memory_space<vmem>>, %arg7: memref<1x128xf32, #tpu.memory_space<vmem>>, %arg8: memref<64x128xf32, #tpu.memory_space<vmem>>, %arg9: memref<64x128xf32, #tpu.memory_space<vmem>>, %arg10: memref<128x128xf32, #tpu.memory_space<vmem>>) attributes {dimension_semantics = [#tpu.dimension_semantics<parallel>], iteration_bounds = array<i64: 1>, scalar_prefetch = 0 : i64, scratch_operands = 0 : i64, tpu.core_type = #tpu.core_type<tc>, window_params = [{transform_indices = @transform_0, window_bounds = array<i64: 128, 256>}, {pipeline_mode = #tpu.pipeline_mode<synchronous>, transform_indices = @transform_1, window_bounds = array<i64: 256, 160>}, {pipeline_mode = #tpu.pipeline_mode<synchronous>, transform_indices = @transform_2, window_bounds = array<i64: 1, 160>}, {pipeline_mode = #tpu.pipeline_mode<synchronous>, transform_indices = @transform_3, window_bounds = array<i64: 256, 256>}, {pipeline_mode = #tpu.pipeline_mode<synchronous>, transform_indices = @transform_4, window_bounds = array<i64: 1, 256>}, {pipeline_mode = #tpu.pipeline_mode<synchronous>, transform_indices = @transform_5, window_bounds = array<i64: 256, 128>}, {pipeline_mode = #tpu.pipeline_mode<synchronous>, transform_indices = @transform_6, window_bounds = array<i64: 1, 128>}, {pipeline_mode = #tpu.pipeline_mode<synchronous>, transform_indices = @transform_7, window_bounds = array<i64: 64, 128>}, {pipeline_mode = #tpu.pipeline_mode<synchronous>, transform_indices = @transform_8, window_bounds = array<i64: 64, 128>}, {transform_indices = @transform_9, window_bounds = array<i64: 128, 128>}]} {
    %c0 = arith.constant 0 : index
    %c0_0 = arith.constant 0 : index
    %0 = vector.load %arg1[%c0, %c0_0] : memref<128x256xbf16, #tpu.memory_space<vmem>>, vector<128x256xbf16>
    %c0_1 = arith.constant 0 : index
    %c0_2 = arith.constant 0 : index
    %1 = vector.load %arg2[%c0_1, %c0_2] : memref<256x160xbf16, #tpu.memory_space<vmem>>, vector<256x160xbf16>
    %cst = arith.constant dense<0.000000e+00> : vector<128x160xf32>
    %2 = tpu.matmul %0, %1, %cst {dimension_numbers = #tpu.dot_dimension_numbers<[1], [0], [0], [1], [0, 0, 1, 1], [], []>} : vector<128x256xbf16>, vector<256x160xbf16>, vector<128x160xf32> -> vector<128x160xf32>
    %c0_3 = arith.constant 0 : index
    %c0_4 = arith.constant 0 : index
    %3 = vector.load %arg3[%c0_3, %c0_4] : memref<1x160xf32, #tpu.memory_space<vmem>>, vector<1x160xf32>
    %4 = vector.broadcast %3 : vector<1x160xf32> to vector<128x160xf32>
    %5 = arith.addf %2, %4 : vector<128x160xf32>
    %6 = vector.extract_strided_slice %5 {offsets = [0, 0], sizes = [64, 160], strides = [1, 1]} : vector<128x160xf32> to vector<64x160xf32>
    %7 = vector.extract_strided_slice %6 {offsets = [0, 0], sizes = [64, 32], strides = [1, 1]} : vector<64x160xf32> to vector<64x32xf32>
    %8 = vector.extract_strided_slice %6 {offsets = [0, 128], sizes = [64, 32], strides = [1, 1]} : vector<64x160xf32> to vector<64x32xf32>
    %cst_5 = arith.constant dense<0.000000e+00> : vector<64x64xf32>
    %9 = tpu.matmul %7, %8, %cst_5 {dimension_numbers = #tpu.dot_dimension_numbers<[1], [1], [0], [0], [0, 0, 1, 0], [], []>} : vector<64x32xf32>, vector<64x32xf32>, vector<64x64xf32> -> vector<64x64xf32>
    %cst_6 = arith.constant dense<0xFF800000> : vector<64xf32>
    %10 = vector.multi_reduction <maximumf>, %9, %cst_6 [1] : vector<64x64xf32> to vector<64xf32>
    %11 = vector.shape_cast %10 : vector<64xf32> to vector<64x1xf32>
    %12 = vector.broadcast %11 : vector<64x1xf32> to vector<64x64xf32>
    %13 = arith.subf %9, %12 : vector<64x64xf32>
    %14 = math.exp %13 : vector<64x64xf32>
    %cst_7 = arith.constant dense<0.000000e+00> : vector<64xf32>
    %15 = vector.multi_reduction <add>, %14, %cst_7 [1] : vector<64x64xf32> to vector<64xf32>
    %16 = vector.shape_cast %15 : vector<64xf32> to vector<64x1xf32>
    %17 = tpu.reciprocal %16 {approx = true} : vector<64x1xf32> -> vector<64x1xf32>
    %18 = vector.broadcast %17 : vector<64x1xf32> to vector<64x64xf32>
    %19 = arith.mulf %14, %18 : vector<64x64xf32>
    %20 = vector.extract_strided_slice %5 {offsets = [64, 0], sizes = [64, 160], strides = [1, 1]} : vector<128x160xf32> to vector<64x160xf32>
    %21 = vector.extract_strided_slice %20 {offsets = [0, 0], sizes = [64, 32], strides = [1, 1]} : vector<64x160xf32> to vector<64x32xf32>
    %22 = vector.extract_strided_slice %20 {offsets = [0, 128], sizes = [64, 32], strides = [1, 1]} : vector<64x160xf32> to vector<64x32xf32>
    %cst_8 = arith.constant dense<0.000000e+00> : vector<64x64xf32>
    %23 = tpu.matmul %21, %22, %cst_8 {dimension_numbers = #tpu.dot_dimension_numbers<[1], [1], [0], [0], [0, 0, 1, 0], [], []>} : vector<64x32xf32>, vector<64x32xf32>, vector<64x64xf32> -> vector<64x64xf32>
    %cst_9 = arith.constant dense<0xFF800000> : vector<64xf32>
    %24 = vector.multi_reduction <maximumf>, %23, %cst_9 [1] : vector<64x64xf32> to vector<64xf32>
    %25 = vector.shape_cast %24 : vector<64xf32> to vector<64x1xf32>
    %26 = vector.broadcast %25 : vector<64x1xf32> to vector<64x64xf32>
    %27 = arith.subf %23, %26 : vector<64x64xf32>
    %28 = math.exp %27 : vector<64x64xf32>
    %cst_10 = arith.constant dense<0.000000e+00> : vector<64xf32>
    %29 = vector.multi_reduction <add>, %28, %cst_10 [1] : vector<64x64xf32> to vector<64xf32>
    %30 = vector.shape_cast %29 : vector<64xf32> to vector<64x1xf32>
    %31 = tpu.reciprocal %30 {approx = true} : vector<64x1xf32> -> vector<64x1xf32>
    %32 = vector.broadcast %31 : vector<64x1xf32> to vector<64x64xf32>
    %33 = arith.mulf %28, %32 : vector<64x64xf32>
    %c0_11 = arith.constant 0 : index
    %c0_12 = arith.constant 0 : index
    %34 = vector.load %arg4[%c0_11, %c0_12] : memref<256x256xbf16, #tpu.memory_space<vmem>>, vector<256x256xbf16>
    %cst_13 = arith.constant dense<0.000000e+00> : vector<128x256xf32>
    %35 = tpu.matmul %0, %34, %cst_13 {dimension_numbers = #tpu.dot_dimension_numbers<[1], [0], [0], [1], [0, 0, 1, 1], [], []>} : vector<128x256xbf16>, vector<256x256xbf16>, vector<128x256xf32> -> vector<128x256xf32>
    %c0_14 = arith.constant 0 : index
    %c0_15 = arith.constant 0 : index
    %36 = vector.load %arg5[%c0_14, %c0_15] : memref<1x256xf32, #tpu.memory_space<vmem>>, vector<1x256xf32>
    %37 = vector.broadcast %36 : vector<1x256xf32> to vector<128x256xf32>
    %38 = arith.addf %35, %37 : vector<128x256xf32>
    %39 = vector.extract_strided_slice %38 {offsets = [0, 0], sizes = [64, 256], strides = [1, 1]} : vector<128x256xf32> to vector<64x256xf32>
    %cst_16 = arith.constant dense<0.000000e+00> : vector<64x256xf32>
    %40 = tpu.matmul %19, %39, %cst_16 {dimension_numbers = #tpu.dot_dimension_numbers<[1], [0], [0], [1], [0, 0, 1, 1], [], []>} : vector<64x64xf32>, vector<64x256xf32>, vector<64x256xf32> -> vector<64x256xf32>
    %41 = vector.extract_strided_slice %38 {offsets = [64, 0], sizes = [64, 256], strides = [1, 1]} : vector<128x256xf32> to vector<64x256xf32>
    %cst_17 = arith.constant dense<0.000000e+00> : vector<64x256xf32>
    %42 = tpu.matmul %33, %41, %cst_17 {dimension_numbers = #tpu.dot_dimension_numbers<[1], [0], [0], [1], [0, 0, 1, 1], [], []>} : vector<64x64xf32>, vector<64x256xf32>, vector<64x256xf32> -> vector<64x256xf32>
    %43 = tpu.concatenate %40, %42 in 0 : vector<64x256xf32>, vector<64x256xf32> -> vector<128x256xf32>
    %44 = arith.extf %0 : vector<128x256xbf16> to vector<128x256xf32>
    %45 = arith.addf %43, %44 : vector<128x256xf32>
    %46 = arith.truncf %45 : vector<128x256xf32> to vector<128x256xbf16>
    %c0_18 = arith.constant 0 : index
    %c0_19 = arith.constant 0 : index
    %47 = vector.load %arg6[%c0_18, %c0_19] : memref<256x128xbf16, #tpu.memory_space<vmem>>, vector<256x128xbf16>
    %cst_20 = arith.constant dense<0.000000e+00> : vector<128x128xf32>
    %48 = tpu.matmul %46, %47, %cst_20 {dimension_numbers = #tpu.dot_dimension_numbers<[1], [0], [0], [1], [0, 0, 1, 1], [], []>} : vector<128x256xbf16>, vector<256x128xbf16>, vector<128x128xf32> -> vector<128x128xf32>
    %c0_21 = arith.constant 0 : index
    %c0_22 = arith.constant 0 : index
    %49 = vector.load %arg7[%c0_21, %c0_22] : memref<1x128xf32, #tpu.memory_space<vmem>>, vector<1x128xf32>
    %50 = vector.broadcast %49 : vector<1x128xf32> to vector<128x128xf32>
    %51 = arith.addf %48, %50 : vector<128x128xf32>
    %cst_23 = arith.constant 0.000000e+00 : f32
    %52 = vector.broadcast %cst_23 : f32 to vector<128x128xf32>
    %53 = arith.maximumf %51, %52 : vector<128x128xf32>
    %c0_24 = arith.constant 0 : index
    %c0_25 = arith.constant 0 : index
    %54 = vector.load %arg8[%c0_24, %c0_25] : memref<64x128xf32, #tpu.memory_space<vmem>>, vector<64x128xf32>
    %c0_26 = arith.constant 0 : index
    %c0_27 = arith.constant 0 : index
    %55 = vector.load %arg9[%c0_26, %c0_27] : memref<64x128xf32, #tpu.memory_space<vmem>>, vector<64x128xf32>
    %56 = vector.extract_strided_slice %53 {offsets = [0, 0], sizes = [64, 128], strides = [1, 1]} : vector<128x128xf32> to vector<64x128xf32>
    %57 = arith.mulf %56, %54 : vector<64x128xf32>
    %58 = arith.addf %57, %55 : vector<64x128xf32>
    %c0_28 = arith.constant 0 : index
    %c0_29 = arith.constant 0 : index
    %59 = vector.load %arg10[%c0_28, %c0_29] : memref<128x128xf32, #tpu.memory_space<vmem>>, vector<64x128xf32>
    tpu.vector_store %arg10[%c0_28, %c0_29], %58 {strides = array<i32>} : memref<128x128xf32, #tpu.memory_space<vmem>>, vector<64x128xf32>,
    %60 = vector.extract_strided_slice %53 {offsets = [64, 0], sizes = [64, 128], strides = [1, 1]} : vector<128x128xf32> to vector<64x128xf32>
    %61 = arith.mulf %60, %54 : vector<64x128xf32>
    %62 = arith.addf %61, %55 : vector<64x128xf32>
    %c64 = arith.constant 64 : index
    %c0_30 = arith.constant 0 : index
    %63 = vector.load %arg10[%c64, %c0_30] : memref<128x128xf32, #tpu.memory_space<vmem>>, vector<64x128xf32>
    tpu.vector_store %arg10[%c64, %c0_30], %62 {strides = array<i32>} : memref<128x128xf32, #tpu.memory_space<vmem>>, vector<64x128xf32>,
    return
  }
  func.func @transform_0(%arg0: i32) -> (i32, i32) {
    %c0_i32 = arith.constant 0 : i32
    %c0_i32_0 = arith.constant 0 : i32
    return %arg0, %c0_i32 : i32, i32
  }
  func.func @transform_1(%arg0: i32) -> (i32, i32) {
    %c0_i32 = arith.constant 0 : i32
    %c0_i32_0 = arith.constant 0 : i32
    %c0_i32_1 = arith.constant 0 : i32
    return %c0_i32, %c0_i32_0 : i32, i32
  }
  func.func @transform_2(%arg0: i32) -> (i32, i32) {
    %c0_i32 = arith.constant 0 : i32
    %c0_i32_0 = arith.constant 0 : i32
    %c0_i32_1 = arith.constant 0 : i32
    return %c0_i32, %c0_i32_0 : i32, i32
  }
  func.func @transform_3(%arg0: i32) -> (i32, i32) {
    %c0_i32 = arith.constant 0 : i32
    %c0_i32_0 = arith.constant 0 : i32
    %c0_i32_1 = arith.constant 0 : i32
    return %c0_i32, %c0_i32_0 : i32, i32
  }
  func.func @transform_4(%arg0: i32) -> (i32, i32) {
    %c0_i32 = arith.constant 0 : i32
    %c0_i32_0 = arith.constant 0 : i32
    %c0_i32_1 = arith.constant 0 : i32
    return %c0_i32, %c0_i32_0 : i32, i32
  }
  func.func @transform_5(%arg0: i32) -> (i32, i32) {
    %c0_i32 = arith.constant 0 : i32
    %c0_i32_0 = arith.constant 0 : i32
    %c0_i32_1 = arith.constant 0 : i32
    return %c0_i32, %c0_i32_0 : i32, i32
  }
  func.func @transform_6(%arg0: i32) -> (i32, i32) {
    %c0_i32 = arith.constant 0 : i32
    %c0_i32_0 = arith.constant 0 : i32
    %c0_i32_1 = arith.constant 0 : i32
    return %c0_i32, %c0_i32_0 : i32, i32
  }
  func.func @transform_7(%arg0: i32) -> (i32, i32) {
    %c0_i32 = arith.constant 0 : i32
    %c0_i32_0 = arith.constant 0 : i32
    %c0_i32_1 = arith.constant 0 : i32
    return %c0_i32, %c0_i32_0 : i32, i32
  }
  func.func @transform_8(%arg0: i32) -> (i32, i32) {
    %c0_i32 = arith.constant 0 : i32
    %c0_i32_0 = arith.constant 0 : i32
    %c0_i32_1 = arith.constant 0 : i32
    return %c0_i32, %c0_i32_0 : i32, i32
  }
  func.func @transform_9(%arg0: i32) -> (i32, i32) {
    %c0_i32 = arith.constant 0 : i32
    %c0_i32_0 = arith.constant 0 : i32
    return %arg0, %c0_i32 : i32, i32
  }
}

</mosaic_0001>

<bundles_post_ra>
// kernel: aesthetic_encoder_sa_forward.1
= control target key start
LH: loop header
LB: loop body
LE: loop exit
PB: predicated region body
PF: predicated region fallthrough
CT: control target
= control target key end

     0   :  { %s3499_s0 = inlined_call_operand.vmem [shape: bf16[128,256], index: 0, kind: input, shape index: {}]   ;;  %s3500_s1 = inlined_call_operand.vmem [shape: bf16[256,160], index: 1, kind: input, shape index: {}]   ;;  %s3501_s2 = inlined_call_operand.vmem [shape: f32[1,160], index: 2, kind: input, shape index: {}]   ;;  %s3502_s3 = inlined_call_operand.vmem [shape: bf16[256,256], index: 3, kind: input, shape index: {}]   ;;  %s3503_s4 = inlined_call_operand.vmem [shape: f32[1,256], index: 4, kind: input, shape index: {}]   ;;  %s3504_s5 = inlined_call_operand.vmem [shape: bf16[256,128], index: 5, kind: input, shape index: {}]   ;;  %s3505_s6 = inlined_call_operand.vmem [shape: f32[1,128], index: 6, kind: input, shape index: {}]   ;;  %s3506_s7 = inlined_call_operand.vmem [shape: f32[64,128], index: 7, kind: input, shape index: {}]   ;;  %s3507_s8 = inlined_call_operand.vmem [shape: f32[64,128], index: 8, kind: input, shape index: {}]   ;;  %s3508_s9 = inlined_call_operand.hbm [shape: f32[128,128], index: 9, kind: output, shape index: {}]  }
   0x1   :  { %v2247_v0 = vld [vmem:[%s3500_s1 + $0x74] ss:$8 sps:$4 sm:$0xff]   ;;  %v2249_v1 = vld [vmem:[%s3500_s1 + $0x70] ss:$8 sps:$4 sm:$0xff]   ;;  %v2250_v2 = vld [vmem:[%s3500_s1 + $0x64] ss:$8 sps:$4 sm:$0xff]  }
   0x2   :  { %334 = vmatprep.subr.bf16.mxu0 %v2247_v0  ;;  %v2252_v3 = vld [vmem:[%s3500_s1 + $0x60] ss:$8 sps:$4 sm:$0xff]   ;;  %v2253_v4 = vld [vmem:[%s3500_s1 + $0x54] ss:$8 sps:$4 sm:$0xff]   ;;  %v2255_v5 = vld [vmem:[%s3500_s1 + $0x50] ss:$8 sps:$4 sm:$0xff]  }
   0x3   :  { %335 = vmatpush1.bf16.msra.mxu0 %v2249_v1  ;;  %v2256_v6 = vld [vmem:[%s3500_s1 + $0x44] ss:$8 sps:$4 sm:$0xff]   ;;  %v2258_v7 = vld [vmem:[%s3500_s1 + $0x40] ss:$8 sps:$4 sm:$0xff]   ;;  %v2259_v8 = vld [vmem:[%s3500_s1 + $0x34] ss:$8 sps:$4 sm:$0xff]  }
   0x4   :  { %336 = vmatprep.subr.bf16.mxu0 %v2250_v2  ;;  %v2261_v9 = vld [vmem:[%s3500_s1 + $0x30] ss:$8 sps:$4 sm:$0xff]   ;;  %v2262_v10 = vld [vmem:[%s3500_s1 + $0x24] ss:$8 sps:$4 sm:$0xff]   ;;  %v2264_v11 = vld [vmem:[%s3500_s1 + $0x20] ss:$8 sps:$4 sm:$0xff]  }
   0x5   :  { %v2265_v12 = vld [vmem:[%s3500_s1 + $0x14] ss:$8 sps:$4 sm:$0xff]   ;;  %v34_v13 = vld [vmem:[%s3499_s0] sm:$0xff]  ;;  %v35_v14 = vld [vmem:[%s3499_s0 + $0x8] sm:$0xff] }
   0x6   :  { %v2576_v15 = vcombine.high %v34_v13, %v35_v14  ;;  %v2267_v16 = vld [vmem:[%s3500_s1 + $0x10] ss:$8 sps:$4 sm:$0xff]   ;;  %v2268_v17 = vld [vmem:[%s3500_s1 + $0x4] ss:$8 sps:$4 sm:$0xff]   ;;  %v2270_v18 = vld [vmem:[%s3500_s1] ss:$8 sps:$4 sm:$0xff]  }
   0x7   :  { %337 = vmatpush1.bf16.msra.mxu0 %v2252_v3  ;;  %v2271_v19 = vld [vmem:[%s3500_s1 + $0xf4] ss:$8 sps:$4 sm:$0xff]   ;;  %v2273_v20 = vld [vmem:[%s3500_s1 + $0xf0] ss:$8 sps:$4 sm:$0xff]   ;;  %v2274_v21 = vld [vmem:[%s3500_s1 + $0xe4] ss:$8 sps:$4 sm:$0xff]  }
   0x8   :  { %338 = vmatprep.subr.bf16.mxu0 %v2253_v4  ;;  %366 = vmatprep.mubr.bf16.mxu0 %v2576_v15  ;;  %v2276_v22 = vld [vmem:[%s3500_s1 + $0xe0] ss:$8 sps:$4 sm:$0xff]   ;;  %v2277_v23 = vld [vmem:[%s3500_s1 + $0xd4] ss:$8 sps:$4 sm:$0xff]   ;;  %v2279_v24 = vld [vmem:[%s3500_s1 + $0xd0] ss:$8 sps:$4 sm:$0xff]  }
   0x9   :  { %v2280_v25 = vld [vmem:[%s3500_s1 + $0xc4] ss:$8 sps:$4 sm:$0xff]   ;;  %v2282_v26 = vld [vmem:[%s3500_s1 + $0xc0] ss:$8 sps:$4 sm:$0xff]   ;;  %v2283_v27 = vld [vmem:[%s3500_s1 + $0xb4] ss:$8 sps:$4 sm:$0xff]  }
   0xa   :  { %v2285_v28 = vld [vmem:[%s3500_s1 + $0xb0] ss:$8 sps:$4 sm:$0xff]   ;;  %v2286_v29 = vld [vmem:[%s3500_s1 + $0xa4] ss:$8 sps:$4 sm:$0xff]  }
   0xb   :  { %339 = vmatpush1.bf16.msra.mxu0 %v2255_v5 }
   0xc   :  { %340 = vmatprep.subr.bf16.mxu0 %v2256_v6 }
   0xf   :  { %341 = vmatpush1.bf16.msra.mxu0 %v2258_v7 }
  0x10   :  { %342 = vmatprep.subr.bf16.mxu0 %v2259_v8 }
  0x13   :  { %343 = vmatpush1.bf16.msra.mxu0 %v2261_v9 }
  0x14   :  { %344 = vmatprep.subr.bf16.mxu0 %v2262_v10 }
  0x17   :  { %345 = vmatpush1.bf16.msra.mxu0 %v2264_v11 }
  0x18   :  { %346 = vmatprep.subr.bf16.mxu0 %v2265_v12 }
  0x1b   :  { %347 = vmatpush1.bf16.msra.mxu0 %v2267_v16 }
  0x1c   :  { %348 = vmatprep.subr.bf16.mxu0 %v2268_v17 }
  0x1f   :  { %349 = vmatpush1.bf16.msra.mxu0 %v2270_v18 }
  0x20   :  { %350 = vmatprep.subr.bf16.mxu0 %v2271_v19 }
  0x23   :  { %351 = vmatpush2.bf16.msra.mxu0 %v2273_v20 }
  0x24   :  { %352 = vmatprep.subr.bf16.mxu0 %v2274_v21 }
  0x27   :  { %353 = vmatpush2.bf16.msra.mxu0 %v2276_v22 }
  0x28   :  { %354 = vmatprep.subr.bf16.mxu0 %v2277_v23 }
  0x2b   :  { %355 = vmatpush2.bf16.msra.mxu0 %v2279_v24 }
  0x2c   :  { %356 = vmatprep.subr.bf16.mxu0 %v2280_v25 }
  0x2f   :  { %357 = vmatpush2.bf16.msra.mxu0 %v2282_v26 }
  0x30   :  { %358 = vmatprep.subr.bf16.mxu0 %v2283_v27 }
  0x31   :  { %14 = vsyncpa [#allocation3], 0  ;;  %v2288_v30 = vld [vmem:[%s3500_s1 + $0xa0] ss:$8 sps:$4 sm:$0xff]   ;;  %v2289_v31 = vld [vmem:[%s3500_s1 + $0x94] ss:$8 sps:$4 sm:$0xff]   ;;  %v2642_v37 = vcombine.low %v34_v13, %v35_v14  ;;  %v84_v4 = vlaneseq }
  0x32   :  { %v2291_v32 = vld [vmem:[%s3500_s1 + $0x90] ss:$8 sps:$4 sm:$0xff]   ;;  %v2292_v33 = vld [vmem:[%s3500_s1 + $0x84] ss:$8 sps:$4 sm:$0xff]   ;;  %v2294_v34 = vld [vmem:[%s3500_s1 + $0x80] ss:$8 sps:$4 sm:$0xff]  }
  0x33   :  { %359 = vmatpush2.bf16.msra.mxu0 %v2285_v28  ;;  %v36_v35 = vld [vmem:[%s3499_s0 + $0x10] sm:$0xff]  ;;  %v37_v36 = vld [vmem:[%s3499_s0 + $0x18] sm:$0xff]  ;;  %v38_v39 = vld [vmem:[%s3499_s0 + $0x20] sm:$0xff]  ;;  %v2742_v7 = vshrl.u32 %v84_v4, 7  ;;  %vm447_vm0 = vcmask 261120   ;;  %vm601_vm1 = vcmask 523264  }
  0x34   :  { %360 = vmatprep.subr.bf16.mxu0 %v2286_v29  ;;  %v2644_v38 = vcombine.high %v36_v35, %v37_v36  ;;  %v39_v40 = vld [vmem:[%s3499_s0 + $0x28] sm:$0xff]  ;;  %v2654_v41 = vcombine.low %v36_v35, %v37_v36  ;;  %v40_v43 = vld [vmem:[%s3499_s0 + $0x30] sm:$0xff]  ;;  %v41_v44 = vld [vmem:[%s3499_s0 + $0x38] sm:$0xff] }
  0x35   :  { %v2656_v42 = vcombine.high %v38_v39, %v39_v40  ;;  %v2666_v45 = vcombine.low %v38_v39, %v39_v40  ;;  %v2668_v46 = vcombine.high %v40_v43, %v41_v44  ;;  %v42_v47 = vld [vmem:[%s3499_s0 + $0x40] sm:$0xff]  ;;  %v43_v48 = vld [vmem:[%s3499_s0 + $0x48] sm:$0xff]  ;;  %v2678_v49 = vcombine.low %v40_v43, %v41_v44  ;;  %v44_v51 = vld [vmem:[%s3499_s0 + $0x50] sm:$0xff] }
  0x36   :  { %v2680_v50 = vcombine.high %v42_v47, %v43_v48  ;;  %v45_v52 = vld [vmem:[%s3499_s0 + $0x58] sm:$0xff]  ;;  %v2690_v53 = vcombine.low %v42_v47, %v43_v48  ;;  %v46_v55 = vld [vmem:[%s3499_s0 + $0x60] sm:$0xff]  ;;  %v47_v56 = vld [vmem:[%s3499_s0 + $0x68] sm:$0xff]  ;;  %v86_v10 = vsub.s32 0, %v2742_v7 }
  0x37   :  { %361 = vmatpush2.bf16.msra.mxu0 %v2288_v30  ;;  %v2692_v54 = vcombine.high %v44_v51, %v45_v52  ;;  %v2702_v57 = vcombine.low %v44_v51, %v45_v52  ;;  %v2704_v58 = vcombine.high %v46_v55, %v47_v56  ;;  %v48_v59 = vld [vmem:[%s3499_s0 + $0x70] sm:$0xff]  ;;  %v49_v60 = vld [vmem:[%s3499_s0 + $0x78] sm:$0xff]  ;;  %v2714_v61 = vcombine.low %v46_v55, %v47_v56  ;;  %v2316_v2 = vld [vmem:[%s3502_s3 + $0x64] ss:$8 sps:$4 sm:$0xff]  }
  0x38   :  { %362 = vmatprep.subr.bf16.mxu0 %v2289_v31  ;;  %v2716_v62 = vcombine.high %v48_v59, %v49_v60  ;;  %v2720_v63 = vcombine.low %v48_v59, %v49_v60  ;;  %v2311_v0 = vld [vmem:[%s3502_s3 + $0x70] ss:$8 sps:$4 sm:$0xff]   ;;  %v2313_v1 = vld [vmem:[%s3502_s3 + $0x74] ss:$8 sps:$4 sm:$0xff]   ;;  %v2314_v3 = vld [vmem:[%s3502_s3 + $0x60] ss:$8 sps:$4 sm:$0xff]  }
  0x39   :  { %v2319_v5 = vld [vmem:[%s3502_s3 + $0x54] ss:$8 sps:$4 sm:$0xff]   ;;  %v2317_v6 = vld [vmem:[%s3502_s3 + $0x50] ss:$8 sps:$4 sm:$0xff]   ;;  %v2322_v8 = vld [vmem:[%s3502_s3 + $0x44] ss:$8 sps:$4 sm:$0xff]  }
  0x3a   :  { %v2320_v9 = vld [vmem:[%s3502_s3 + $0x40] ss:$8 sps:$4 sm:$0xff]   ;;  %v2325_v11 = vld [vmem:[%s3502_s3 + $0x34] ss:$8 sps:$4 sm:$0xff]   ;;  %v2323_v13 = vld [vmem:[%s3502_s3 + $0x30] ss:$8 sps:$4 sm:$0xff]  }
  0x3b   :  { %363 = vmatpush2.bf16.msra.mxu0 %v2291_v32  ;;  %v82_v12 = vld [vmem:[%s3501_s2] sm:$0x3]  ;;  %v2331_v19 = vld [vmem:[%s3502_s3 + $0x14] ss:$8 sps:$4 sm:$0xff]   ;;  %v2329_v22 = vld [vmem:[%s3502_s3 + $0x10] ss:$8 sps:$4 sm:$0xff]  }
  0x3c   :  { %364 = vmatprep.subr.bf16.mxu0 %v2292_v33  ;;  %v2762_v14 = vrot.slane %v82_v12, %v86_v10  ;;  %v2326_v17 = vld [vmem:[%s3502_s3 + $0x20] ss:$8 sps:$4 sm:$0xff]   ;;  %v2334_v23 = vld [vmem:[%s3502_s3 + $0x4] ss:$8 sps:$4 sm:$0xff]   ;;  %v2337_v27 = vld [vmem:[%s3502_s3 + $0xf4] ss:$8 sps:$4 sm:$0xff]  }
  0x3d   :  { %v2332_v26 = vld [vmem:[%s3502_s3] ss:$8 sps:$4 sm:$0xff]   ;;  %v2335_v30 = vld [vmem:[%s3502_s3 + $0xf0] ss:$8 sps:$4 sm:$0xff]   ;;  %v2340_v31 = vld [vmem:[%s3502_s3 + $0xe4] ss:$8 sps:$4 sm:$0xff]  }
  0x3e   :  { %v2343_v35 = vld [vmem:[%s3502_s3 + $0xd4] ss:$8 sps:$4 sm:$0xff]   ;;  %v2341_v40 = vld [vmem:[%s3502_s3 + $0xd0] ss:$8 sps:$4 sm:$0xff]   ;;  %v2346_v43 = vld [vmem:[%s3502_s3 + $0xc4] ss:$8 sps:$4 sm:$0xff]  }
  0x3f   :  { %365 = vmatpush2.bf16.msra.mxu0 %v2294_v34  ;;  %v2338_v34 = vld [vmem:[%s3502_s3 + $0xe0] ss:$8 sps:$4 sm:$0xff]   ;;  %v90_v51 = vsub.s32 1, %v2742_v7  ;;  %v2349_v52 = vld [vmem:[%s3502_s3 + $0xb4] ss:$8 sps:$4 sm:$0xff]  }
  0x40   :  { %1135 = vmatprep.subr.bf16.mxu0 %v2313_v1  ;;  %v2344_v48 = vld [vmem:[%s3502_s3 + $0xc0] ss:$8 sps:$4 sm:$0xff]   ;;  %v2347_v59 = vld [vmem:[%s3502_s3 + $0xb0] ss:$8 sps:$4 sm:$0xff]  }
  0x41   :  { %v2837_v60 = vrot.slane %v82_v12, %v90_v51  ;;  %v2350_v4 = vld [vmem:[%s3502_s3 + $0xa0] ss:$8 sps:$4 sm:$0xff]  }
  0x42   :  { %367 = vmatmul.mubr.bf16.vlgmr.msra.gmra.mxu0 %v2642_v37 }
  0x43   :  { %376 = vmatprep.mubr.bf16.mxu0 %v2644_v38  ;;  %1136 = vmatpush1.bf16.msra.mxu0 %v2311_v0  ;;  %v2352_v0 = vld [vmem:[%s3502_s3 + $0xa4] ss:$8 sps:$4 sm:$0xff]  }
  0x44   :  { %1137 = vmatprep.subr.bf16.mxu0 %v2316_v2 }
  0x47   :  { %1138 = vmatpush1.bf16.msra.mxu0 %v2314_v3 }
  0x48   :  { %1139 = vmatprep.subr.bf16.mxu0 %v2319_v5 }
  0x4a   :  { %377 = vmatmul.mubr.bf16.gmra.mxu0 %v2654_v41 }
  0x4b   :  { %386 = vmatprep.mubr.bf16.mxu0 %v2656_v42  ;;  %1140 = vmatpush1.bf16.msra.mxu0 %v2317_v6  ;;  %v2355_v6 = vld [vmem:[%s3502_s3 + $0x94] ss:$8 sps:$4 sm:$0xff]  }
  0x4c   :  { %1141 = vmatprep.subr.bf16.mxu0 %v2322_v8 }
  0x4f   :  { %1142 = vmatpush1.bf16.msra.mxu0 %v2320_v9 }
  0x50   :  { %1143 = vmatprep.subr.bf16.mxu0 %v2325_v11  ;;  %v2353_v11 = vld [vmem:[%s3502_s3 + $0x90] ss:$8 sps:$4 sm:$0xff]  }
  0x52   :  { %387 = vmatmul.mubr.bf16.gmra.mxu0 %v2666_v45 }
  0x53   :  { %396 = vmatprep.mubr.bf16.mxu0 %v2668_v46  ;;  %1144 = vmatpush1.bf16.msra.mxu0 %v2323_v13  ;;  %v2358_v13 = vld [vmem:[%s3502_s3 + $0x84] ss:$8 sps:$4 sm:$0xff]  }
  0x5a   :  { %397 = vmatmul.mubr.bf16.gmra.mxu0 %v2678_v49 }
  0x5b   :  { %406 = vmatprep.mubr.bf16.mxu0 %v2680_v50 }
  0x62   :  { %407 = vmatmul.mubr.bf16.gmra.mxu0 %v2690_v53 }
  0x63   :  { %416 = vmatprep.mubr.bf16.mxu0 %v2692_v54 }
  0x6a   :  { %417 = vmatmul.mubr.bf16.gmra.mxu0 %v2702_v57 }
  0x6b   :  { %426 = vmatprep.mubr.bf16.mxu0 %v2704_v58 }
  0x72   :  { %427 = vmatmul.mubr.bf16.gmra.mxu0 %v2714_v61 }
  0x73   :  { %436 = vmatprep.mubr.bf16.mxu0 %v2716_v62 }
  0x7a   :  { %437 = vmatmul.mubr.bf16.gmra.mxu0 %v2720_v63 }
  0x7b   :  { %1167 = vmatprep.mubr.bf16.mxu0 %v2576_v15  ;;  %v2328_v15 = vld [vmem:[%s3502_s3 + $0x24] ss:$8 sps:$4 sm:$0xff]  }
  0x7c   :  { %1145 = vmatprep.subr.bf16.mxu0 %v2328_v15 }
  0x7d   :  { %1146 = vmatpush1.bf16.msra.mxu0 %v2326_v17  ;;  %v2356_v17 = vld [vmem:[%s3502_s3 + $0x80] ss:$8 sps:$4 sm:$0xff]  }
  0x7e   :  { %1147 = vmatprep.subr.bf16.mxu0 %v2331_v19 }
  0x81   :  { %1148 = vmatpush1.bf16.msra.mxu0 %v2329_v22 }
  0x82   :  { %1149 = vmatprep.subr.bf16.mxu0 %v2334_v23 }
  0x85   :  { %1150 = vmatpush1.bf16.msra.mxu0 %v2332_v26 }
  0x86   :  { %1151 = vmatprep.subr.bf16.mxu0 %v2337_v27 }
  0x89   :  { %1152 = vmatpush2.bf16.msra.mxu0 %v2335_v30 }
  0x8a   :  { %1153 = vmatprep.subr.bf16.mxu0 %v2340_v31 }
  0x8d   :  { %1154 = vmatpush2.bf16.msra.mxu0 %v2338_v34 }
  0x8e   :  { %1155 = vmatprep.subr.bf16.mxu0 %v2343_v35 }
  0x91   :  { %1156 = vmatpush2.bf16.msra.mxu0 %v2341_v40 }
  0x92   :  { %1157 = vmatprep.subr.bf16.mxu0 %v2346_v43 }
  0x95   :  { %1158 = vmatpush2.bf16.msra.mxu0 %v2344_v48 }
  0x96   :  { %1159 = vmatprep.subr.bf16.mxu0 %v2349_v52 }
  0x99   :  { %1160 = vmatpush2.bf16.msra.mxu0 %v2347_v59 }
  0x9a   :  { %1161 = vmatprep.subr.bf16.mxu0 %v2352_v0 }
  0x9d   :  { %1162 = vmatpush2.bf16.msra.mxu0 %v2350_v4 }
  0x9e   :  { %1163 = vmatprep.subr.bf16.mxu0 %v2355_v6 }
  0xa1   :  { %1164 = vmatpush2.bf16.msra.mxu0 %v2353_v11 }
  0xa2   :  { %1165 = vmatprep.subr.bf16.mxu0 %v2358_v13 }
  0xa5   :  { %1166 = vmatpush2.bf16.msra.mxu0 %v2356_v17 }
  0xa8   :  { %1168 = vmatmul.mubr.bf16.vlgmr.msra.gmra.mxu0 %v2642_v37 }
  0xa9   :  { %1177 = vmatprep.mubr.bf16.mxu0 %v2644_v38 }
  0xb0   :  { %1178 = vmatmul.mubr.bf16.gmra.mxu0 %v2654_v41 }
  0xb1   :  { %1187 = vmatprep.mubr.bf16.mxu0 %v2656_v42 }
  0xb8   :  { %1188 = vmatmul.mubr.bf16.gmra.mxu0 %v2666_v45 }
  0xb9   :  { %1197 = vmatprep.mubr.bf16.mxu0 %v2668_v46 }
  0xc0   :  { %1198 = vmatmul.mubr.bf16.gmra.mxu0 %v2678_v49 }
  0xc1   :  { %1207 = vmatprep.mubr.bf16.mxu0 %v2680_v50 }
  0xc8   :  { %1208 = vmatmul.mubr.bf16.gmra.mxu0 %v2690_v53 }
  0xc9   :  { %1217 = vmatprep.mubr.bf16.mxu0 %v2692_v54 }
  0xd0   :  { %1218 = vmatmul.mubr.bf16.gmra.mxu0 %v2702_v57 }
  0xd1   :  { %1227 = vmatprep.mubr.bf16.mxu0 %v2704_v58 }
  0xd8   :  { %1228 = vmatmul.mubr.bf16.gmra.mxu0 %v2714_v61 }
  0xd9   :  { %1237 = vmatprep.mubr.bf16.mxu0 %v2716_v62 }
  0xe0   :  { %1238 = vmatmul.mubr.bf16.gmra.mxu0 %v2720_v63 }
 0x102   :  { %v368_v16 = vpop.f32.mrf.mxu0 }
 0x103   :  { %v369_v18 = vadd.f32 %v368_v16, %v2762_v14 }
 0x104   :  { %v2774_v20 = vpop.f32.mrf.mxu0 }
 0x105   :  { %2187 = vmatprep.mubr.msk.f32.mxu1 %vm447_vm0, %v369_v18  ;;  %v371_v38 = vadd.f32 %v2774_v20, %v2837_v60 }
 0x106   :  { %v2777_v21 = vpop.f32.mrf.mxu0 }
 0x107   :  { %v373_v41 = vadd.f32 %v2777_v21, %v2762_v14 }
 0x108   :  { %v2785_v24 = vpop.f32.mrf.mxu0 }
 0x109   :  { %v375_v34 = vadd.f32 %v2785_v24, %v2837_v60 }
 0x10a   :  { %v2787_v25 = vpop.f32.mrf.mxu0 }
 0x10b   :  { %v379_v42 = vadd.f32 %v2787_v25, %v2762_v14 }
 0x10c   :  { %v2795_v28 = vpop.f32.mrf.mxu0 }
 0x10d   :  { %v381_v30 = vadd.f32 %v2795_v28, %v2837_v60 }
 0x10e   :  { %v2797_v29 = vpop.f32.mrf.mxu0 }
 0x10f   :  { %v383_v21 = vadd.f32 %v2797_v29, %v2762_v14 }
 0x110   :  { %v384_v32 = vpop.f32.mrf.mxu0 }
 0x111   :  { %v385_v23 = vadd.f32 %v384_v32, %v2837_v60 }
 0x112   :  { %v2805_v33 = vpop.f32.mrf.mxu0 }
 0x113   :  { %v389_v45 = vadd.f32 %v2805_v33, %v2762_v14 }
 0x114   :  { %v390_v36 = vpop.f32.mrf.mxu0 }
 0x115   :  { %v391_v18 = vadd.f32 %v390_v36, %v2837_v60 }
 0x116   :  { %v2813_v39 = vpop.f32.mrf.mxu0 }
 0x117   :  { %v393_v25 = vadd.f32 %v2813_v39, %v2762_v14 }
 0x118   :  { %v394_v44 = vpop.f32.mrf.mxu0 }
 0x119   :  { %v395_v12 = vadd.f32 %v394_v44, %v2837_v60 }
 0x11a   :  { %v2821_v47 = vpop.f32.mrf.mxu0 }
 0x11b   :  { %v399_v29 = vadd.f32 %v2821_v47, %v2762_v14 }
 0x11c   :  { %v400_v55 = vpop.f32.mrf.mxu0 }
 0x11d   :  { %v401_v5 = vadd.f32 %v400_v55, %v2837_v60 }
 0x11e   :  { %v2830_v56 = vpop.f32.mrf.mxu0 }
 0x11f   :  { %v403_v39 = vadd.f32 %v2830_v56, %v2762_v14 }
 0x120   :  { %v404_v1 = vpop.f32.mrf.mxu0 }
 0x121   :  { %v405_v2 = vadd.f32 %v404_v1, %v2837_v60 }
 0x122   :  { %v2843_v3 = vpop.f32.mrf.mxu0 }
 0x123   :  { %2171 = vmatprep.subr.msk.mxu1 %vm447_vm0, %v405_v2  ;;  %v409_v49 = vadd.f32 %v2843_v3, %v2762_v14 }
 0x124   :  { %v2853_v8 = vpop.f32.mrf.mxu0  ;;  %2172 = vmatpush3.xpose.msk.msra.mxu1 %vm447_vm0, %v405_v2 }
 0x125   :  { %2173 = vmatprep.subr.msk.mxu1 %vm447_vm0, %v401_v5  ;;  %v411_v53 = vadd.f32 %v2853_v8, %v2837_v60 }
 0x126   :  { %v2857_v9 = vpop.f32.mrf.mxu0 }
 0x127   :  { %v413_v54 = vadd.f32 %v2857_v9, %v2762_v14 }
 0x128   :  { %v2866_v15 = vpop.f32.mrf.mxu0  ;;  %2174 = vmatpush3.xpose.msk.msra.mxu1 %vm447_vm0, %v401_v5 }
 0x129   :  { %2175 = vmatprep.subr.msk.mxu1 %vm447_vm0, %v395_v12  ;;  %v415_v44 = vadd.f32 %v2866_v15, %v2837_v60 }
 0x12a   :  { %v2870_v16 = vpop.f32.mrf.mxu0 }
 0x12b   :  { %v419_v47 = vadd.f32 %v2870_v16, %v2762_v14 }
 0x12c   :  { %v2876_v19 = vpop.f32.mrf.mxu0  ;;  %2176 = vmatpush3.xpose.msk.msra.mxu1 %vm447_vm0, %v395_v12 }
 0x12d   :  { %2177 = vmatprep.subr.msk.mxu1 %vm447_vm0, %v391_v18  ;;  %v421_v50 = vadd.f32 %v2876_v19, %v2837_v60 }
 0x12e   :  { %v2880_v22 = vpop.f32.mrf.mxu0 }
 0x12f   :  { %v423_v57 = vadd.f32 %v2880_v22, %v2762_v14 }
 0x130   :  { %v424_v26 = vpop.f32.mrf.mxu0  ;;  %2178 = vmatpush3.xpose.msk.msra.mxu1 %vm447_vm0, %v391_v18 }
 0x131   :  { %2179 = vmatprep.subr.msk.mxu1 %vm447_vm0, %v385_v23  ;;  %v425_v43 = vadd.f32 %v424_v26, %v2837_v60 }
 0x132   :  { %v2886_v27 = vpop.f32.mrf.mxu0 }
 0x133   :  { %v429_v58 = vadd.f32 %v2886_v27, %v2762_v14 }
 0x134   :  { %v430_v31 = vpop.f32.mrf.mxu0  ;;  %2180 = vmatpush3.xpose.msk.msra.mxu1 %vm447_vm0, %v385_v23 }
 0x135   :  { %2181 = vmatprep.subr.msk.mxu1 %vm447_vm0, %v381_v30  ;;  %v431_v33 = vadd.f32 %v430_v31, %v2837_v60 }
 0x136   :  { %v2893_v32 = vpop.f32.mrf.mxu0 }
 0x137   :  { %v433_v61 = vadd.f32 %v2893_v32, %v2762_v14 }
 0x138   :  { %v434_v35 = vpop.f32.mrf.mxu0  ;;  %2182 = vmatpush3.xpose.msk.msra.mxu1 %vm447_vm0, %v381_v30 }
 0x139   :  { %2183 = vmatprep.subr.msk.mxu1 %vm447_vm0, %v375_v34  ;;  %v435_v46 = vadd.f32 %v434_v35, %v2837_v60 }
 0x13a   :  { %v2900_v37 = vpop.f32.mrf.mxu0 }
 0x13b   :  { %v439_v62 = vadd.f32 %v2900_v37, %v2762_v14 }
 0x13c   :  { %v440_v28 = vpop.f32.mrf.mxu0  ;;  %2184 = vmatpush3.xpose.msk.msra.mxu1 %vm447_vm0, %v375_v34 }
 0x13d   :  { %2185 = vmatprep.subr.msk.mxu1 %vm447_vm0, %v371_v38  ;;  %v441_v20 = vadd.f32 %v440_v28, %v2837_v60 }
 0x13e   :  { %v2907_v24 = vpop.f32.mrf.mxu0 }
 0x13f   :  { %v443_v48 = vadd.f32 %v2907_v24, %v2762_v14 }
 0x140   :  { %v444_v36 = vpop.f32.mrf.mxu0  ;;  %2186 = vmatpush3.xpose.msk.msra.mxu1 %vm447_vm0, %v371_v38 }
 0x141   :  { %v445_v40 = vadd.f32 %v444_v36, %v2837_v60 }
 0x143   :  { %2188 = vmatmul.mubr.msk.f32.vlgmr.msra.gmra.mxu1 %vm447_vm0, %v373_v41  ;;  %2199 = vmatprep.subr.msk.mxu1 %vm447_vm0, %v445_v40 }
 0x144   :  { %2190 = vmatprep.mubr.msk.f32.mxu1 %vm447_vm0, %v379_v42  ;;  %2200 = vmatpush3.xpose.msk.msra.mxu1 %vm447_vm0, %v445_v40 }
 0x145   :  { %2201 = vmatprep.subr.msk.mxu1 %vm447_vm0, %v441_v20 }
 0x147   :  { %2191 = vmatmul.mubr.msk.f32.gmra.mxu1 %vm447_vm0, %v383_v21 }
 0x148   :  { %2193 = vmatprep.mubr.msk.f32.mxu1 %vm447_vm0, %v389_v45  ;;  %2202 = vmatpush3.xpose.msk.msra.mxu1 %vm447_vm0, %v441_v20 }
 0x149   :  { %2203 = vmatprep.subr.msk.mxu1 %vm447_vm0, %v435_v46 }
 0x14b   :  { %2194 = vmatmul.mubr.msk.f32.gmra.mxu1 %vm447_vm0, %v393_v25 }
 0x14c   :  { %2196 = vmatprep.mubr.msk.f32.mxu1 %vm447_vm0, %v399_v29  ;;  %2204 = vmatpush3.xpose.msk.msra.mxu1 %vm447_vm0, %v435_v46  ;;  %v963_v46 = vld [vmem:[%s3503_s4] sm:$0x3] }
 0x14d   :  { %2205 = vmatprep.subr.msk.mxu1 %vm447_vm0, %v431_v33  ;;  %v3062_v29 = vrot.slane %v963_v46, %v86_v10 }
 0x14f   :  { %2197 = vmatmul.mubr.msk.f32.gmra.mxu1 %vm447_vm0, %v403_v39  ;;  %v3066_v39 = vrot.slane %v963_v46, %v90_v51 }
 0x150   :  { %2206 = vmatpush3.xpose.msk.msra.mxu1 %vm447_vm0, %v431_v33  ;;  %2215 = vmatprep.mubr.msk.f32.mxu1 %vm447_vm0, %v409_v49 }
 0x151   :  { %2207 = vmatprep.subr.msk.mxu1 %vm447_vm0, %v425_v43 }
 0x154   :  { %2208 = vmatpush3.xpose.msk.msra.mxu1 %vm447_vm0, %v425_v43 }
 0x155   :  { %2209 = vmatprep.subr.msk.mxu1 %vm447_vm0, %v421_v50 }
 0x158   :  { %2210 = vmatpush3.xpose.msk.msra.mxu1 %vm447_vm0, %v421_v50 }
 0x159   :  { %2211 = vmatprep.subr.msk.mxu1 %vm447_vm0, %v415_v44 }
 0x15c   :  { %2212 = vmatpush3.xpose.msk.msra.mxu1 %vm447_vm0, %v415_v44 }
 0x15d   :  { %2213 = vmatprep.subr.msk.mxu1 %vm447_vm0, %v411_v53 }
 0x160   :  { %2214 = vmatpush3.xpose.msk.msra.mxu1 %vm447_vm0, %v411_v53 }
 0x163   :  { %2216 = vmatmul.mubr.msk.f32.vlgmr.msra.gmra.mxu1 %vm447_vm0, %v413_v54 }
 0x164   :  { %2218 = vmatprep.mubr.msk.f32.mxu1 %vm447_vm0, %v419_v47 }
 0x167   :  { %2219 = vmatmul.mubr.msk.f32.gmra.mxu1 %vm447_vm0, %v423_v57 }
 0x168   :  { %2221 = vmatprep.mubr.msk.f32.mxu1 %vm447_vm0, %v429_v58  ;;  %v1169_v35 = vpop.f32.mrf.mxu0 }
 0x16a   :  { %v1171_v37 = vpop.f32.mrf.mxu0 }
 0x16b   :  { %2222 = vmatmul.mubr.msk.f32.gmra.mxu1 %vm447_vm0, %v433_v61 }
 0x16c   :  { %2224 = vmatprep.mubr.msk.f32.mxu1 %vm447_vm0, %v439_v62  ;;  %v1173_v38 = vpop.f32.mrf.mxu0 }
 0x16e   :  { %v1175_v28 = vpop.f32.mrf.mxu0 }
 0x16f   :  { %2225 = vmatmul.mubr.msk.f32.gmra.mxu1 %vm447_vm0, %v443_v48  ;;  %v1176_v48 = vadd.f32 %v1175_v28, %v3066_v39 }
 0x170   :  { %v1179_v24 = vpop.f32.mrf.mxu0 }
 0x171   :  { %v1180_v62 = vadd.f32 %v1179_v24, %v3062_v29 }
 0x172   :  { %v1181_v36 = vpop.f32.mrf.mxu0 }
 0x173   :  { %v1182_v61 = vadd.f32 %v1181_v36, %v3066_v39 }
 0x174   :  { %v1183_v41 = vpop.f32.mrf.mxu0 }
 0x175   :  { %v1184_v58 = vadd.f32 %v1183_v41, %v3062_v29 }
 0x176   :  { %v1185_v40 = vpop.f32.mrf.mxu0 }
 0x177   :  { %v1186_v57 = vadd.f32 %v1185_v40, %v3066_v39 }
 0x178   :  { %v1189_v42 = vpop.f32.mrf.mxu0 }
 0x179   :  { %v1190_v51 = vadd.f32 %v1189_v42, %v3062_v29 }
 0x17a   :  { %v1191_v20 = vpop.f32.mrf.mxu0 }
 0x17b   :  { %v1192_v7 = vadd.f32 %v1191_v20, %v3066_v39 }
 0x17c   :  { %v1193_v21 = vpop.f32.mrf.mxu0 }
 0x17d   :  { %v1194_v10 = vadd.f32 %v1193_v21, %v3062_v29 }
 0x17e   :  { %v1195_v45 = vpop.f32.mrf.mxu0 }
 0x17f   :  { %v1196_v47 = vadd.f32 %v1195_v45, %v3066_v39 }
 0x180   :  { %v1199_v25 = vpop.f32.mrf.mxu0 }
 0x181   :  { %v1200_v54 = vadd.f32 %v1199_v25, %v3062_v29 }
 0x182   :  { %v1201_v33 = vpop.f32.mrf.mxu0 }
 0x183   :  { %v1202_v44 = vadd.f32 %v1201_v33, %v3066_v39 }
 0x184   :  { %v1203_v49 = vpop.f32.mrf.mxu0 }
 0x185   :  { %v1204_v43 = vadd.f32 %v1203_v49, %v3062_v29 }
 0x186   :  { %v1205_v50 = vpop.f32.mrf.mxu0 }
 0x187   :  { %v1206_v53 = vadd.f32 %v1205_v50, %v3066_v39 }
 0x189   :  { %1288 = vmatprep.subr.mxu0 %v1206_v53  ;;  %2227 = vmatprep.subr.mxu1 %v1206_v53 }
 0x18a   :  { %1289 = vmatpush1.msra.mxu0 %v1204_v43  ;;  %2235 = vmatpush1.msra.mxu1 %v1204_v43 }
 0x18b   :  { %1290 = vmatprep.subr.mxu0 %v1202_v44  ;;  %2228 = vmatprep.subr.mxu1 %v1202_v44 }
 0x18c   :  { %1291 = vmatpush1.msra.mxu0 %v1200_v54  ;;  %2236 = vmatpush1.msra.mxu1 %v1200_v54 }
 0x18d   :  { %1292 = vmatprep.subr.mxu0 %v1196_v47  ;;  %2229 = vmatprep.subr.mxu1 %v1196_v47 }
 0x18e   :  { %1293 = vmatpush1.msra.mxu0 %v1194_v10  ;;  %2237 = vmatpush1.msra.mxu1 %v1194_v10 }
 0x18f   :  { %1294 = vmatprep.subr.mxu0 %v1192_v7  ;;  %2230 = vmatprep.subr.mxu1 %v1192_v7 }
 0x190   :  { %1295 = vmatpush1.msra.mxu0 %v1190_v51  ;;  %2238 = vmatpush1.msra.mxu1 %v1190_v51 }
 0x191   :  { %1296 = vmatprep.subr.mxu0 %v1186_v57  ;;  %2231 = vmatprep.subr.mxu1 %v1186_v57 }
 0x192   :  { %1297 = vmatpush1.msra.mxu0 %v1184_v58  ;;  %2239 = vmatpush1.msra.mxu1 %v1184_v58 }
 0x193   :  { %1298 = vmatprep.subr.mxu0 %v1182_v61  ;;  %2232 = vmatprep.subr.mxu1 %v1182_v61 }
 0x194   :  { %1299 = vmatpush1.msra.mxu0 %v1180_v62  ;;  %2240 = vmatpush1.msra.mxu1 %v1180_v62 }
 0x195   :  { %1300 = vmatprep.subr.mxu0 %v1176_v48  ;;  %2233 = vmatprep.subr.mxu1 %v1176_v48 }
 0x203   :  { %v2993_v52 = vpop.f32.mrf.mxu1 }
 0x204   :  { %v605_v60 = vsel %vm601_vm1, %v2993_v52, -inf }
 0x205   :  { %v2995_v55 = vpop.f32.mrf.mxu1 }
 0x206   :  { %v602_v63 = vsel %vm601_vm1, %v2995_v55, -inf }
 0x207   :  { %603 = vmax.xlane.f32.xlu0 %v602_v63  ;;  %v2999_v56 = vpop.f32.mrf.mxu1  ;;  %v1174_v63 = vadd.f32 %v1173_v38, %v3062_v29 }
 0x208   :  { %v611_v2 = vsel %vm601_vm1, %v2999_v56, -inf }
 0x209   :  { %v3001_v59 = vpop.f32.mrf.mxu1  ;;  %1301 = vmatpush1.msra.mxu0 %v1174_v63  ;;  %2241 = vmatpush1.msra.mxu1 %v1174_v63 }
 0x20a   :  { %v608_v14 = vsel %vm601_vm1, %v3001_v59, -inf }
 0x20b   :  { %606 = vmax.xlane.f32.xlu0 %v605_v60  ;;  %609 = vmax.xlane.f32.xlu1 %v608_v14  ;;  %v3007_v0 = vpop.f32.mrf.mxu1  ;;  %v1172_v60 = vadd.f32 %v1171_v37, %v3066_v39  ;;  %v1170_v14 = vadd.f32 %v1169_v35, %v3062_v29 }
 0x20c   :  { %v617_v6 = vsel %vm601_vm1, %v3007_v0, -inf }
 0x20d   :  { %v3009_v1 = vpop.f32.mrf.mxu1  ;;  %1302 = vmatprep.subr.mxu0 %v1172_v60  ;;  %2234 = vmatprep.subr.mxu1 %v1172_v60 }
 0x20e   :  { %v614_v3 = vsel %vm601_vm1, %v3009_v1, -inf  ;;  %1303 = vmatpush1.msra.mxu0 %v1170_v14  ;;  %2242 = vmatpush1.msra.mxu1 %v1170_v14 }
 0x20f   :  { %612 = vmax.xlane.f32.xlu1 %v611_v2  ;;  %615 = vmax.xlane.f32.xlu0 %v614_v3  ;;  %v3015_v4 = vpop.f32.mrf.mxu1 }
 0x210   :  { %v623_v9 = vsel %vm601_vm1, %v3015_v4, -inf }
 0x211   :  { %v3017_v5 = vpop.f32.mrf.mxu1 }
 0x212   :  { %v620_v8 = vsel %vm601_vm1, %v3017_v5, -inf }
 0x213   :  { %618 = vmax.xlane.f32.xlu1 %v617_v6  ;;  %621 = vmax.xlane.f32.xlu0 %v620_v8  ;;  %v3085_v6 = vpop.f32.mrf.mxu0 }
 0x217   :  { %624 = vmax.xlane.f32.xlu1 %v623_v9 }
 0x223   :  { %v3025_v11 = vpop.f32.mrf.mxu1 }
 0x224   :  { %v846_v12 = vsel %vm601_vm1, %v3025_v11, -inf }
 0x225   :  { %847 = vmax.xlane.f32.xlu1 %v846_v12  ;;  %v3029_v13 = vpop.f32.mrf.mxu1 }
 0x226   :  { %v843_v15 = vsel %vm601_vm1, %v3029_v13, -inf }
 0x227   :  { %v3033_v16 = vpop.f32.mrf.mxu1  ;;  %844 = vmax.xlane.f32.xlu0 %v843_v15 }
 0x228   :  { %v852_v17 = vsel %vm601_vm1, %v3033_v16, -inf }
 0x229   :  { %853 = vmax.xlane.f32.xlu1 %v852_v17  ;;  %v3037_v18 = vpop.f32.mrf.mxu1 }
 0x22a   :  { %v849_v19 = vsel %vm601_vm1, %v3037_v18, -inf }
 0x22b   :  { %v3041_v22 = vpop.f32.mrf.mxu1  ;;  %850 = vmax.xlane.f32.xlu0 %v849_v19  ;;  %v3089_v19 = vpop.f32.mrf.mxu0 }
 0x22c   :  { %v858_v23 = vsel %vm601_vm1, %v3041_v22, -inf }
 0x22d   :  { %859 = vmax.xlane.f32.xlu1 %v858_v23  ;;  %v3045_v26 = vpop.f32.mrf.mxu1  ;;  %v3093_v37 = vpop.f32.mrf.mxu0 }
 0x22e   :  { %v855_v27 = vsel %vm601_vm1, %v3045_v26, -inf }
 0x22f   :  { %v3049_v30 = vpop.f32.mrf.mxu1  ;;  %856 = vmax.xlane.f32.xlu0 %v855_v27  ;;  %v3097_v41 = vpop.f32.mrf.mxu0 }
 0x230   :  { %v864_v31 = vsel %vm601_vm1, %v3049_v30, -inf }
 0x231   :  { %865 = vmax.xlane.f32.xlu1 %v864_v31  ;;  %v3053_v32 = vpop.f32.mrf.mxu1  ;;  %v3100_v20 = vpop.f32.mrf.mxu0 }
 0x232   :  { %v861_v34 = vsel %vm601_vm1, %v3053_v32, -inf }
 0x233   :  { %862 = vmax.xlane.f32.xlu0 %v861_v34 }
 0x290   :  { %v604_v2 = vpop.xlane.xlu0 %603 }
 0x291   :  { %v626_v3 = vsub.f32 %v2995_v55, %v604_v2 }
 0x293   :  { %v634_v8 = vmul.f32 1.442695, %v626_v3 }
 0x294   :  { %v607_v9 = vpop.xlane.xlu0 %606  ;;  %v610_v12 = vpop.xlane.xlu1 %609 }
 0x295   :  { %2375 = vpow2.f32 %v634_v8  ;;  %v627_v15 = vsub.f32 %v2993_v52, %v607_v9  ;;  %v628_v17 = vsub.f32 %v3001_v59, %v610_v12 }
 0x297   :  { %v636_v23 = vmul.f32 1.442695, %v627_v15  ;;  %v638_v27 = vmul.f32 1.442695, %v628_v17 }
 0x298   :  { %v613_v31 = vpop.xlane.xlu1 %612  ;;  %v616_v34 = vpop.xlane.xlu0 %615 }
 0x299   :  { %2377 = vpow2.f32 %v636_v23  ;;  %v629_v35 = vsub.f32 %v2999_v56, %v613_v31  ;;  %v630_v55 = vsub.f32 %v3009_v1, %v616_v34 }
 0x29a   :  { %2379 = vpow2.f32 %v638_v27 }
 0x29b   :  { %v640_v38 = vmul.f32 1.442695, %v629_v35  ;;  %v642_v28 = vmul.f32 1.442695, %v630_v55 }
 0x29c   :  { %v619_v24 = vpop.xlane.xlu1 %618  ;;  %v622_v52 = vpop.xlane.xlu0 %621 }
 0x29d   :  { %2381 = vpow2.f32 %v640_v38  ;;  %v631_v59 = vsub.f32 %v3007_v0, %v619_v24  ;;  %v632_v36 = vsub.f32 %v3017_v5, %v622_v52  ;;  %v3106_v5 = vpop.f32.mrf.mxu0 }
 0x29e   :  { %2383 = vpow2.f32 %v642_v28 }
 0x29f   :  { %v644_v40 = vmul.f32 1.442695, %v631_v59  ;;  %v646_v42 = vmul.f32 1.442695, %v632_v36  ;;  %v3116_v49 = vpop.f32.mrf.mxu0 }
 0x2a0   :  { %v625_v56 = vpop.xlane.xlu1 %624 }
 0x2a1   :  { %2385 = vpow2.f32 %v644_v40  ;;  %v633_v1 = vsub.f32 %v3015_v4, %v625_v56  ;;  %v3126_v54 = vpop.f32.mrf.mxu0  ;;  %v2477_v40 = vmov 0.0  }
 0x2a2   :  { %v3102_v21 = vpop.eup %2375  ;;  %2387 = vpow2.f32 %v646_v42  ;;  %1336 = vmatprep.mubr.f32.mxu0 %v2477_v40  ;;  %1348 = vmatprep.mubr.f32.mxu1 %v2477_v40 }
 0x2a3   :  { %v648_v45 = vmul.f32 1.442695, %v633_v1  ;;  %v650_v0 = vsel %vm601_vm1, %v3102_v21, 0.0  ;;  %v3138_v63 = vpop.f32.mrf.mxu0 }
 0x2a4   :  { %651 = vadd.xlane.f32.xlu0 %v650_v0 }
 0x2a5   :  { %2389 = vpow2.f32 %v648_v45  ;;  %v3145_v8 = vpop.f32.mrf.mxu0 }
 0x2a6   :  { %v3108_v46 = vpop.eup %2377 }
 0x2a7   :  { %v3110_v25 = vpop.eup %2379  ;;  %v653_v4 = vsel %vm601_vm1, %v3108_v46, 0.0  ;;  %v3148_v15 = vpop.f32.mrf.mxu0 }
 0x2a8   :  { %654 = vadd.xlane.f32.xlu1 %v653_v4  ;;  %v656_v33 = vsel %vm601_vm1, %v3110_v25, 0.0 }
 0x2a9   :  { %657 = vadd.xlane.f32.xlu0 %v656_v33  ;;  %v3151_v31 = vpop.f32.mrf.mxu0 }
 0x2aa   :  { %v3118_v43 = vpop.eup %2381 }
 0x2ab   :  { %v3120_v50 = vpop.eup %2383  ;;  %v659_v44 = vsel %vm601_vm1, %v3118_v43, 0.0  ;;  %v3154_v55 = vpop.f32.mrf.mxu0 }
 0x2ac   :  { %660 = vadd.xlane.f32.xlu1 %v659_v44  ;;  %v662_v53 = vsel %vm601_vm1, %v3120_v50, 0.0 }
 0x2ad   :  { %663 = vadd.xlane.f32.xlu0 %v662_v53  ;;  %v1241_v24 = vpop.f32.mrf.mxu0 }
 0x2ae   :  { %v3128_v47 = vpop.eup %2385  ;;  %v848_v10 = vpop.xlane.xlu1 %847 }
 0x2af   :  { %v3130_v7 = vpop.eup %2387  ;;  %v868_v51 = vsub.f32 %v3025_v11, %v848_v10  ;;  %v665_v57 = vsel %vm601_vm1, %v3128_v47, 0.0  ;;  %v1243_v36 = vpop.f32.mrf.mxu0 }
 0x2b0   :  { %666 = vadd.xlane.f32.xlu1 %v665_v57  ;;  %v668_v58 = vsel %vm601_vm1, %v3130_v7, 0.0  ;;  %v845_v61 = vpop.xlane.xlu0 %844 }
 0x2b1   :  { %v877_v62 = vmul.f32 1.442695, %v868_v51  ;;  %669 = vadd.xlane.f32.xlu0 %v668_v58  ;;  %v867_v48 = vsub.f32 %v3029_v13, %v845_v61  ;;  %v1245_v42 = vpop.f32.mrf.mxu0 }
 0x2b2   :  { %v3140_v60 = vpop.eup %2389  ;;  %v854_v14 = vpop.xlane.xlu1 %853  ;;  %v1246_v1 = vadd.f32 %v1245_v42, %v3066_v39 }
 0x2b3   :  { %2391 = vpow2.f32 %v877_v62  ;;  %v875_v2 = vmul.f32 1.442695, %v867_v48  ;;  %v870_v11 = vsub.f32 %v3033_v16, %v854_v14  ;;  %v671_v3 = vsel %vm601_vm1, %v3140_v60, 0.0 }
 0x2b4   :  { %672 = vadd.xlane.f32.xlu1 %v671_v3  ;;  %v851_v9 = vpop.xlane.xlu0 %850  ;;  %1425 = vmatprep.subr.mxu1 %v1246_v1  ;;  %v1210_v1 = vadd.f32 %v3085_v6, %v3062_v29 }
 0x2b5   :  { %2393 = vpow2.f32 %v875_v2  ;;  %v881_v12 = vmul.f32 1.442695, %v870_v11  ;;  %v869_v13 = vsub.f32 %v3037_v18, %v851_v9 }
 0x2b6   :  { %v860_v17 = vpop.xlane.xlu1 %859 }
 0x2b7   :  { %2395 = vpow2.f32 %v881_v12  ;;  %v879_v23 = vmul.f32 1.442695, %v869_v13  ;;  %v872_v27 = vsub.f32 %v3041_v22, %v860_v17 }
 0x2b8   :  { %v857_v16 = vpop.xlane.xlu0 %856 }
 0x2b9   :  { %2397 = vpow2.f32 %v879_v23  ;;  %v885_v34 = vmul.f32 1.442695, %v872_v27  ;;  %v871_v35 = vsub.f32 %v3045_v26, %v857_v16 }
 0x2ba   :  { %v866_v38 = vpop.xlane.xlu1 %865 }
 0x2bb   :  { %2399 = vpow2.f32 %v885_v34  ;;  %v883_v28 = vmul.f32 1.442695, %v871_v35  ;;  %v874_v18 = vsub.f32 %v3049_v30, %v866_v38  ;;  %v1244_v34 = vadd.f32 %v1243_v36, %v3062_v29 }
 0x2bc   :  { %v863_v52 = vpop.xlane.xlu0 %862  ;;  %v1224_v36 = vadd.f32 %v3116_v49, %v3062_v29 }
 0x2bd   :  { %2401 = vpow2.f32 %v883_v28  ;;  %v889_v59 = vmul.f32 1.442695, %v874_v18  ;;  %v873_v22 = vsub.f32 %v3053_v32, %v863_v52  ;;  %v1242_v28 = vadd.f32 %v1241_v24, %v3066_v39 }
 0x2be   :  { %v1232_v24 = vadd.f32 %v3145_v8, %v3066_v39  ;;  %v1222_v8 = vadd.f32 %v3106_v5, %v3066_v39  ;;  %v1214_v5 = vadd.f32 %v3093_v37, %v3062_v29 }
 0x2bf   :  { %2403 = vpow2.f32 %v889_v59  ;;  %v887_v26 = vmul.f32 1.442695, %v873_v22  ;;  %v1230_v22 = vadd.f32 %v3138_v63, %v3062_v29  ;;  %v1220_v63 = vadd.f32 %v3100_v20, %v3062_v29 }
 0x2c0   :  { %v3160_v56 = vpop.eup %2391  ;;  %v1212_v20 = vadd.f32 %v3089_v19, %v3066_v39 }
 0x2c1   :  { %2405 = vpow2.f32 %v887_v26  ;;  %v894_v30 = vsel %vm601_vm1, %v3160_v56, 0.0 }
 0x2c2   :  { %v3165_v45 = vpop.eup %2393  ;;  %895 = vadd.xlane.f32.xlu1 %v894_v30 }
 0x2c3   :  { %v891_v32 = vsel %vm601_vm1, %v3165_v45, 0.0 }
 0x2c4   :  { %v3169_v0 = vpop.eup %2395  ;;  %892 = vadd.xlane.f32.xlu0 %v891_v32 }
 0x2c5   :  { %v900_v4 = vsel %vm601_vm1, %v3169_v0, 0.0 }
 0x2c6   :  { %v3173_v33 = vpop.eup %2397  ;;  %901 = vadd.xlane.f32.xlu1 %v900_v4  ;;  %v2361_v4 = vld [vmem:[%s3504_s5 + $0x70] sm:$0xff]  }
 0x2c7   :  { %v897_v44 = vsel %vm601_vm1, %v3173_v33, 0.0 }
 0x2c8   :  { %v3177_v53 = vpop.eup %2399  ;;  %898 = vadd.xlane.f32.xlu0 %v897_v44 }
 0x2c9   :  { %v906_v10 = vsel %vm601_vm1, %v3177_v53, 0.0 }
 0x2ca   :  { %v3181_v51 = vpop.eup %2401  ;;  %907 = vadd.xlane.f32.xlu1 %v906_v10  ;;  %v2362_v10 = vld [vmem:[%s3504_s5 + $0x30] sm:$0xff]  }
 0x2cb   :  { %v903_v57 = vsel %vm601_vm1, %v3181_v51, 0.0 }
 0x2cc   :  { %v3185_v58 = vpop.eup %2403  ;;  %904 = vadd.xlane.f32.xlu0 %v903_v57 }
 0x2cd   :  { %v912_v61 = vsel %vm601_vm1, %v3185_v58, 0.0 }
 0x2ce   :  { %v3189_v62 = vpop.eup %2405  ;;  %913 = vadd.xlane.f32.xlu1 %v912_v61 }
 0x2cf   :  { %v909_v48 = vsel %vm601_vm1, %v3189_v62, 0.0 }
 0x2d0   :  { %910 = vadd.xlane.f32.xlu0 %v909_v48 }
 0x32d   :  { %v652_v14 = vpop.xlane.xlu0 %651 }
 0x32e   :  { %2407 = vrcp.f32 %v652_v14  ;;  %v2364_v14 = vld [vmem:[%s3504_s5 + $0x28] sm:$0xff]  }
 0x331   :  { %v655_v2 = vpop.xlane.xlu1 %654 }
 0x332   :  { %2409 = vrcp.f32 %v655_v2  ;;  %v658_v11 = vpop.xlane.xlu0 %657 }
 0x333   :  { %2411 = vrcp.f32 %v658_v11 }
 0x335   :  { %v661_v3 = vpop.xlane.xlu1 %660 }
 0x336   :  { %2413 = vrcp.f32 %v661_v3  ;;  %v664_v9 = vpop.xlane.xlu0 %663 }
 0x337   :  { %2415 = vrcp.f32 %v664_v9  ;;  %v2366_v9 = vld [vmem:[%s3504_s5 + $0x20] sm:$0xff]  }
 0x339   :  { %v667_v12 = vpop.xlane.xlu1 %666 }
 0x33a   :  { %2417 = vrcp.f32 %v667_v12  ;;  %v670_v23 = vpop.xlane.xlu0 %669 }
 0x33b   :  { %v2408_v13 = vpop.eup %2407  ;;  %2419 = vrcp.f32 %v670_v23 }
 0x33c   :  { %v682_v17 = vmul.f32 %v2408_v13, %v3102_v21  ;;  %v1240_v21 = vadd.f32 %v3154_v55, %v3062_v29  ;;  %v1234_v55 = vadd.f32 %v3148_v15, %v3062_v29 }
 0x33d   :  { %v673_v18 = vpop.xlane.xlu1 %672 }
 0x33e   :  { %2042 = vmatmul.mubr.msk.f32.vlgmr.msra.gmra.mxu0 %vm601_vm1, %v682_v17  ;;  %2421 = vrcp.f32 %v673_v18  ;;  %v2368_v17 = vld [vmem:[%s3504_s5 + $0x18] sm:$0xff]  }
 0x33f   :  { %v2410_v27 = vpop.eup %2409  ;;  %1342 = vmatprep.mubr.f32.mxu0 %v2477_v40 }
 0x340   :  { %v2412_v16 = vpop.eup %2411  ;;  %v683_v35 = vmul.f32 %v2410_v27, %v3108_v46  ;;  %v1236_v46 = vadd.f32 %v3151_v31, %v3066_v39 }
 0x341   :  { %v684_v38 = vmul.f32 %v2412_v16, %v3110_v25 }
 0x342   :  { %2043 = vmatmul.mubr.msk.f32.gmra.mxu0 %vm601_vm1, %v683_v35 }
 0x343   :  { %v2414_v52 = vpop.eup %2413  ;;  %2044 = vmatmul.mubr.msk.f32.vlgmr.msra.gmra.mxu1 %vm601_vm1, %v684_v38 }
 0x344   :  { %1426 = vmatpush1.msra.mxu1 %v1244_v34  ;;  %1354 = vmatprep.mubr.f32.mxu1 %v2477_v40  ;;  %v685_v59 = vmul.f32 %v2414_v52, %v3118_v43  ;;  %v2416_v25 = vpop.eup %2415  ;;  %v1226_v43 = vadd.f32 %v3126_v54, %v3066_v39  ;;  %v2439_v52 = vld [vmem:[%s3499_s0 + $0x8] sm:$0xff] }
 0x345   :  { %1427 = vmatprep.subr.mxu1 %v1242_v28  ;;  %v686_v31 = vmul.f32 %v2416_v25, %v3120_v50  ;;  %v1216_v50 = vadd.f32 %v3097_v41, %v3066_v39  ;;  %v2359_v41 = vld [vmem:[%s3504_s5 + $0x78] sm:$0xff]   ;;  %v2371_v28 = vld [vmem:[%s3504_s5 + $0x48] sm:$0xff]  }
 0x346   :  { %1428 = vmatpush1.msra.mxu1 %v1240_v21 }
 0x347   :  { %1429 = vmatprep.subr.mxu1 %v1236_v46  ;;  %2045 = vmatmul.mubr.msk.f32.gmra.mxu1 %vm601_vm1, %v685_v59  ;;  %v2418_v15 = vpop.eup %2417  ;;  %v1524_v59 = vunpack.c.l.bf16 %v2439_v52  ;;  %v2440_v46 = vld [vmem:[%s3499_s0] sm:$0xff] }
 0x348   :  { %1430 = vmatpush1.msra.mxu1 %v1234_v55  ;;  %1360 = vmatprep.mubr.f32.mxu1 %v2477_v40  ;;  %v687_v49 = vmul.f32 %v2418_v15, %v3128_v47  ;;  %v2420_v42 = vpop.eup %2419  ;;  %v1523_v25 = vunpack.c.h.bf16 %v2440_v46  ;;  %v1525_v55 = vunpack.c.h.bf16 %v2439_v52  ;;  %v2447_v52 = vld [vmem:[%s3499_s0 + $0x48] sm:$0xff] }
 0x349   :  { %1431 = vmatprep.subr.mxu1 %v1232_v24  ;;  %v688_v47 = vmul.f32 %v2420_v42, %v3130_v7  ;;  %v2360_v7 = vld [vmem:[%s3504_s5 + $0x38] sm:$0xff]   ;;  %v1522_v24 = vunpack.c.l.bf16 %v2440_v46  ;;  %v2448_v46 = vld [vmem:[%s3499_s0 + $0x40] sm:$0xff] }
 0x34a   :  { %1432 = vmatpush1.msra.mxu1 %v1230_v22 }
 0x34b   :  { %1433 = vmatprep.subr.mxu1 %v1226_v43  ;;  %2046 = vmatmul.mubr.msk.f32.gmra.mxu1 %vm601_vm1, %v686_v31  ;;  %v896_v54 = vpop.xlane.xlu1 %895  ;;  %v2422_v30 = vpop.eup %2421 }
 0x34c   :  { %1434 = vmatpush1.msra.mxu1 %v1224_v36  ;;  %1366 = vmatprep.mubr.f32.mxu1 %v2477_v40  ;;  %v689_v19 = vmul.f32 %v2422_v30, %v3140_v60 }
 0x34d   :  { %1435 = vmatprep.subr.mxu1 %v1222_v8  ;;  %v893_v26 = vpop.xlane.xlu0 %892 }
 0x34e   :  { %1436 = vmatpush1.msra.mxu1 %v1220_v63  ;;  %2423 = vrcp.f32 %v893_v26 }
 0x34f   :  { %1437 = vmatprep.subr.mxu1 %v1216_v50  ;;  %2047 = vmatmul.mubr.msk.f32.gmra.mxu1 %vm601_vm1, %v687_v49  ;;  %2425 = vrcp.f32 %v896_v54  ;;  %v902_v39 = vpop.xlane.xlu1 %901  ;;  %v2441_v54 = vld [vmem:[%s3499_s0 + $0x10] sm:$0xff]  ;;  %v2442_v49 = vld [vmem:[%s3499_s0 + $0x18] sm:$0xff] }
 0x350   :  { %1438 = vmatpush1.msra.mxu1 %v1214_v5  ;;  %1372 = vmatprep.mubr.f32.mxu1 %v2477_v40  ;;  %v1527_v26 = vunpack.c.h.bf16 %v2441_v54  ;;  %v1529_v42 = vunpack.c.h.bf16 %v2442_v49 }
 0x351   :  { %1439 = vmatprep.subr.mxu1 %v1212_v20  ;;  %v899_v37 = vpop.xlane.xlu0 %898 }
 0x352   :  { %1440 = vmatpush1.msra.mxu1 %v1210_v1  ;;  %2427 = vrcp.f32 %v899_v37  ;;  %v1528_v1 = vunpack.c.l.bf16 %v2442_v49  ;;  %v2449_v49 = vld [vmem:[%s3499_s0 + $0x58] sm:$0xff] }
 0x353   :  { %2048 = vmatmul.mubr.msk.f32.gmra.mxu1 %vm601_vm1, %v688_v47  ;;  %2107 = vmatprep.subr.bf16.mxu1 %v2359_v41  ;;  %2429 = vrcp.f32 %v902_v39  ;;  %v908_v60 = vpop.xlane.xlu1 %907  ;;  %v1526_v47 = vunpack.c.l.bf16 %v2441_v54 }
 0x354   :  { %1378 = vmatprep.mubr.f32.mxu1 %v2477_v40 }
 0x355   :  { %v905_v29 = vpop.xlane.xlu0 %904 }
 0x356   :  { %2431 = vrcp.f32 %v905_v29 }
 0x357   :  { %2049 = vmatmul.mubr.msk.f32.gmra.mxu1 %vm601_vm1, %v689_v19  ;;  %2433 = vrcp.f32 %v908_v60  ;;  %v914_v3 = vpop.xlane.xlu1 %913  ;;  %v2444_v60 = vld [vmem:[%s3499_s0 + $0x28] sm:$0xff] }
 0x358   :  { %1473 = vmatprep.mubr.f32.mxu1 %v2477_v40 }
 0x359   :  { %v911_v48 = vpop.xlane.xlu0 %910 }
 0x35a   :  { %2435 = vrcp.f32 %v911_v48 }
 0x35b   :  { %v2424_v6 = vpop.eup %2423  ;;  %2437 = vrcp.f32 %v914_v3 }
 0x35c   :  { %v923_v32 = vmul.f32 %v2424_v6, %v3165_v45  ;;  %v2426_v44 = vpop.eup %2425  ;;  %v2363_v45 = vld [vmem:[%s3504_s5 + $0x68] sm:$0xff]  }
 0x35d   :  { %v924_v57 = vmul.f32 %v2426_v44, %v3160_v56  ;;  %v2365_v56 = vld [vmem:[%s3504_s5 + $0x60] sm:$0xff]  }
 0x35e   :  { %2050 = vmatmul.mubr.msk.f32.vlgmr.msra.gmra.mxu1 %vm601_vm1, %v923_v32 }
 0x35f   :  { %1479 = vmatprep.mubr.f32.mxu1 %v2477_v40  ;;  %2108 = vmatpush3.bf16.msra.mxu1 %v2360_v7  ;;  %v2428_v61 = vpop.eup %2427 }
 0x360   :  { %2109 = vmatprep.subr.bf16.mxu1 %v2361_v4  ;;  %v925_v2 = vmul.f32 %v2428_v61, %v3173_v33  ;;  %v2430_v11 = vpop.eup %2429  ;;  %v2367_v33 = vld [vmem:[%s3504_s5 + $0x58] sm:$0xff]   ;;  %v2443_v4 = vld [vmem:[%s3499_s0 + $0x20] sm:$0xff]  ;;  %v1532_v61 = vunpack.c.l.bf16 %v2444_v60 }
 0x361   :  { %v926_v12 = vmul.f32 %v2430_v11, %v3169_v0  ;;  %v2369_v0 = vld [vmem:[%s3504_s5 + $0x50] sm:$0xff]   ;;  %v1531_v44 = vunpack.c.h.bf16 %v2443_v4 }
 0x362   :  { %2051 = vmatmul.mubr.msk.f32.gmra.mxu1 %vm601_vm1, %v924_v57 }
 0x363   :  { %1485 = vmatprep.mubr.f32.mxu1 %v2477_v40  ;;  %2110 = vmatpush3.bf16.msra.mxu1 %v2362_v10  ;;  %v2432_v13 = vpop.eup %2431  ;;  %v1533_v10 = vunpack.c.h.bf16 %v2444_v60 }
 0x364   :  { %2111 = vmatprep.subr.bf16.mxu1 %v2363_v45  ;;  %v927_v23 = vmul.f32 %v2432_v13, %v3181_v51  ;;  %v2434_v27 = vpop.eup %2433  ;;  %v2445_v13 = vld [vmem:[%s3499_s0 + $0x30] sm:$0xff] }
 0x365   :  { %v928_v16 = vmul.f32 %v2434_v27, %v3177_v53  ;;  %v2370_v53 = vld [vmem:[%s3504_s5 + $0x10] sm:$0xff]  }
 0x366   :  { %2052 = vmatmul.mubr.msk.f32.gmra.mxu1 %vm601_vm1, %v925_v2 }
 0x367   :  { %1491 = vmatprep.mubr.f32.mxu1 %v2477_v40  ;;  %2112 = vmatpush3.bf16.msra.mxu1 %v2364_v14  ;;  %v2436_v34 = vpop.eup %2435  ;;  %v1530_v14 = vunpack.c.l.bf16 %v2443_v4 }
 0x368   :  { %2113 = vmatprep.subr.bf16.mxu1 %v2365_v56  ;;  %v929_v51 = vmul.f32 %v2436_v34, %v3189_v62  ;;  %v2438_v35 = vpop.eup %2437  ;;  %v2372_v62 = vld [vmem:[%s3504_s5 + $0x8] sm:$0xff]  }
 0x369   :  { %v930_v38 = vmul.f32 %v2438_v35, %v3185_v58  ;;  %v2374_v58 = vld [vmem:[%s3504_s5] sm:$0xff]   ;;  %v1534_v35 = vunpack.c.l.bf16 %v2445_v13 }
 0x36a   :  { %2053 = vmatmul.mubr.msk.f32.gmra.mxu1 %vm601_vm1, %v926_v12 }
 0x36b   :  { %1497 = vmatprep.mubr.f32.mxu1 %v2477_v40  ;;  %2114 = vmatpush3.bf16.msra.mxu1 %v2366_v9 }
 0x36c   :  { %2115 = vmatprep.subr.bf16.mxu1 %v2367_v33 }
 0x36e   :  { %2054 = vmatmul.mubr.msk.f32.gmra.mxu1 %vm601_vm1, %v927_v23  ;;  %v2446_v23 = vld [vmem:[%s3499_s0 + $0x38] sm:$0xff] }
 0x36f   :  { %1503 = vmatprep.mubr.f32.mxu1 %v2477_v40  ;;  %2116 = vmatpush3.bf16.msra.mxu1 %v2368_v17  ;;  %v1535_v17 = vunpack.c.h.bf16 %v2445_v13  ;;  %v1536_v34 = vunpack.c.l.bf16 %v2446_v23 }
 0x370   :  { %2117 = vmatprep.subr.bf16.mxu1 %v2369_v0  ;;  %v1537_v0 = vunpack.c.h.bf16 %v2446_v23 }
 0x372   :  { %2055 = vmatmul.mubr.msk.f32.gmra.mxu1 %vm601_vm1, %v928_v16 }
 0x373   :  { %1509 = vmatprep.mubr.f32.mxu1 %v2477_v40  ;;  %2118 = vmatpush3.bf16.msra.mxu1 %v2370_v53 }
 0x374   :  { %2119 = vmatprep.subr.bf16.mxu1 %v2371_v28 }
 0x376   :  { %2056 = vmatmul.mubr.msk.f32.gmra.mxu1 %vm601_vm1, %v929_v51 }
 0x377   :  { %1515 = vmatprep.mubr.f32.mxu1 %v2477_v40  ;;  %2120 = vmatpush3.bf16.msra.mxu1 %v2372_v62  ;;  %v2373_v40 = vld [vmem:[%s3504_s5 + $0x40] sm:$0xff]  }
 0x378   :  { %2121 = vmatprep.subr.bf16.mxu1 %v2373_v40 }
 0x37a   :  { %2057 = vmatmul.mubr.msk.f32.gmra.mxu1 %vm601_vm1, %v930_v38 }
 0x37b   :  { %2122 = vmatpush3.bf16.msra.mxu1 %v2374_v58 }
 0x3fe   :  { %v1338_v21 = vpop.f32.mrf.mxu0 }
 0x3ff   :  { %v1554_v50 = vadd.f32 %v1522_v24, %v1338_v21  ;;  %v1538_v24 = vunpack.c.l.bf16 %v2448_v46 }
 0x400   :  { %v1340_v18 = vpop.f32.mrf.mxu0 }
 0x401   :  { %v1555_v36 = vadd.f32 %v1523_v25, %v1340_v18  ;;  %v1539_v25 = vunpack.c.h.bf16 %v2448_v46 }
 0x402   :  { %v1344_v22 = vpop.f32.mrf.mxu0 }
 0x403   :  { %v1350_v43 = vpop.f32.mrf.mxu1  ;;  %v1556_v31 = vadd.f32 %v1524_v59, %v1344_v22  ;;  %v1540_v59 = vunpack.c.l.bf16 %v2447_v52 }
 0x404   :  { %v1346_v15 = vpop.f32.mrf.mxu0  ;;  %v1558_v32 = vadd.f32 %v1526_v47, %v1350_v43 }
 0x405   :  { %v1557_v8 = vadd.f32 %v1525_v55, %v1346_v15  ;;  %v1352_v63 = vpop.f32.mrf.mxu1  ;;  %v1586_v41 = vpack.c.bf16 %v1556_v31, %v1554_v50  ;;  %v1541_v55 = vunpack.c.h.bf16 %v2447_v52 }
 0x406   :  { %v1559_v30 = vadd.f32 %v1527_v26, %v1352_v63 }
 0x407   :  { %v1587_v5 = vpack.c.bf16 %v1557_v8, %v1555_v36  ;;  %v1356_v20 = vpop.f32.mrf.mxu1 }
 0x408   :  { %v1560_v29 = vadd.f32 %v1528_v1, %v1356_v20 }
 0x409   :  { %v1358_v37 = vpop.f32.mrf.mxu1  ;;  %1769 = vmatprep.mubr.bf16.mxu1 %v1587_v5  ;;  %v2450_v5 = vld [vmem:[%s3499_s0 + $0x50] sm:$0xff] }
 0x40a   :  { %v1561_v39 = vadd.f32 %v1529_v42, %v1358_v37  ;;  %1770 = vmatmul.mubr.bf16.vlgmr.msra.gmra.mxu1 %v1586_v41  ;;  %v1588_v45 = vpack.c.bf16 %v1560_v29, %v1558_v32  ;;  %v1544_v42 = vunpack.c.l.bf16 %v2449_v49  ;;  %v1543_v20 = vunpack.c.h.bf16 %v2450_v5 }
 0x40b   :  { %v1362_v19 = vpop.f32.mrf.mxu1  ;;  %v1545_v41 = vunpack.c.h.bf16 %v2449_v49  ;;  %v1542_v1 = vunpack.c.l.bf16 %v2450_v5 }
 0x40c   :  { %v1589_v6 = vpack.c.bf16 %v1561_v39, %v1559_v30  ;;  %v1562_v33 = vadd.f32 %v1530_v14, %v1362_v19 }
 0x40d   :  { %v1364_v7 = vpop.f32.mrf.mxu1 }
 0x40e   :  { %1777 = vmatprep.mubr.bf16.mxu1 %v1589_v6  ;;  %v1563_v2 = vadd.f32 %v1531_v44, %v1364_v7  ;;  %v2451_v44 = vld [vmem:[%s3499_s0 + $0x68] sm:$0xff] }
 0x40f   :  { %v1368_v57 = vpop.f32.mrf.mxu1  ;;  %v1548_v60 = vunpack.c.l.bf16 %v2451_v44 }
 0x410   :  { %v1564_v3 = vadd.f32 %v1532_v61, %v1368_v57 }
 0x411   :  { %v1370_v48 = vpop.f32.mrf.mxu1 }
 0x412   :  { %v1565_v56 = vadd.f32 %v1533_v10, %v1370_v48  ;;  %1778 = vmatmul.mubr.bf16.gmra.mxu1 %v1588_v45  ;;  %v1590_v16 = vpack.c.bf16 %v1564_v3, %v1562_v33  ;;  %v2452_v10 = vld [vmem:[%s3499_s0 + $0x60] sm:$0xff]  ;;  %v1549_v45 = vunpack.c.h.bf16 %v2451_v44 }
 0x413   :  { %v1374_v11 = vpop.f32.mrf.mxu1  ;;  %v1547_v57 = vunpack.c.h.bf16 %v2452_v10  ;;  %v1546_v61 = vunpack.c.l.bf16 %v2452_v10 }
 0x414   :  { %v1591_v9 = vpack.c.bf16 %v1565_v56, %v1563_v2  ;;  %v1566_v40 = vadd.f32 %v1534_v35, %v1374_v11 }
 0x415   :  { %v1376_v12 = vpop.f32.mrf.mxu1 }
 0x416   :  { %1785 = vmatprep.mubr.bf16.mxu1 %v1591_v9  ;;  %v1567_v38 = vadd.f32 %v1535_v17, %v1376_v12  ;;  %v2453_v17 = vld [vmem:[%s3499_s0 + $0x78] sm:$0xff] }
 0x417   :  { %v1380_v27 = vpop.f32.mrf.mxu1  ;;  %v1552_v23 = vunpack.c.l.bf16 %v2453_v17 }
 0x418   :  { %v1568_v28 = vadd.f32 %v1536_v34, %v1380_v27 }
 0x419   :  { %v1382_v51 = vpop.f32.mrf.mxu1 }
 0x41a   :  { %v1569_v53 = vadd.f32 %v1537_v0, %v1382_v51  ;;  %1786 = vmatmul.mubr.bf16.gmra.mxu1 %v1590_v16  ;;  %v1592_v21 = vpack.c.bf16 %v1568_v28, %v1566_v40  ;;  %v2454_v0 = vld [vmem:[%s3499_s0 + $0x70] sm:$0xff]  ;;  %v1553_v16 = vunpack.c.h.bf16 %v2453_v17  ;;  %v3436_v17 = vld [vmem:[%s3506_s7 + $0x28] sm:$0xff] }
 0x41b   :  { %v1551_v27 = vunpack.c.h.bf16 %v2454_v0  ;;  %v1550_v34 = vunpack.c.l.bf16 %v2454_v0 }
 0x41c   :  { %v1593_v62 = vpack.c.bf16 %v1569_v53, %v1567_v38 }
 0x41e   :  { %1793 = vmatprep.mubr.bf16.mxu1 %v1593_v62  ;;  %v1475_v58 = vpop.f32.mrf.mxu1 }
 0x41f   :  { %v1570_v8 = vadd.f32 %v1538_v24, %v1475_v58 }
 0x420   :  { %v1477_v18 = vpop.f32.mrf.mxu1 }
 0x421   :  { %v1571_v15 = vadd.f32 %v1539_v25, %v1477_v18  ;;  %v3366_v18 = vld [vmem:[%s3505_s6] ss:$0 sm:$0xff] }
 0x422   :  { %v1481_v22 = vpop.f32.mrf.mxu1  ;;  %1794 = vmatmul.mubr.bf16.gmra.mxu1 %v1592_v21 }
 0x423   :  { %v1572_v43 = vadd.f32 %v1540_v59, %v1481_v22 }
 0x424   :  { %v1483_v31 = vpop.f32.mrf.mxu1 }
 0x425   :  { %v1573_v36 = vadd.f32 %v1541_v55, %v1483_v31  ;;  %v1594_v54 = vpack.c.bf16 %v1572_v43, %v1570_v8  ;;  %v3372_v55 = vld [vmem:[%s3506_s7] sm:$0xff] }
 0x426   :  { %v1487_v63 = vpop.f32.mrf.mxu1  ;;  %v3377_v31 = vld [vmem:[%s3507_s8] sm:$0xff] }
 0x427   :  { %v1595_v50 = vpack.c.bf16 %v1573_v36, %v1571_v15  ;;  %v1574_v29 = vadd.f32 %v1542_v1, %v1487_v63  ;;  %v3384_v63 = vld [vmem:[%s3506_s7 + $0x8] sm:$0xff]  ;;  %v3397_v1 = vld [vmem:[%s3506_s7 + $0x10] sm:$0xff] }
 0x428   :  { %v1489_v26 = vpop.f32.mrf.mxu1 }
 0x429   :  { %1801 = vmatprep.mubr.bf16.mxu1 %v1595_v50  ;;  %v1575_v39 = vadd.f32 %v1543_v20, %v1489_v26 }
 0x42a   :  { %v1493_v37 = vpop.f32.mrf.mxu1  ;;  %1802 = vmatmul.mubr.bf16.gmra.mxu1 %v1594_v54 }
 0x42b   :  { %v1576_v47 = vadd.f32 %v1544_v42, %v1493_v37  ;;  %v3390_v42 = vld [vmem:[%s3507_s8 + $0x8] sm:$0xff] }
 0x42c   :  { %v1495_v30 = vpop.f32.mrf.mxu1 }
 0x42d   :  { %v1577_v19 = vadd.f32 %v1545_v41, %v1495_v30  ;;  %v1596_v32 = vpack.c.bf16 %v1576_v47, %v1574_v29 }
 0x42e   :  { %v1499_v6 = vpop.f32.mrf.mxu1 }
 0x42f   :  { %v1597_v7 = vpack.c.bf16 %v1577_v19, %v1575_v39  ;;  %v1578_v3 = vadd.f32 %v1546_v61, %v1499_v6  ;;  %v3403_v19 = vld [vmem:[%s3507_s8 + $0x10] sm:$0xff] }
 0x430   :  { %v1501_v4 = vpop.f32.mrf.mxu1 }
 0x431   :  { %1809 = vmatprep.mubr.bf16.mxu1 %v1597_v7  ;;  %v1579_v56 = vadd.f32 %v1547_v57, %v1501_v4  ;;  %v3416_v57 = vld [vmem:[%s3507_s8 + $0x18] sm:$0xff] }
 0x432   :  { %v1505_v48 = vpop.f32.mrf.mxu1  ;;  %1810 = vmatmul.mubr.bf16.gmra.mxu1 %v1596_v32  ;;  %v3410_v32 = vld [vmem:[%s3506_s7 + $0x18] sm:$0xff] }
 0x433   :  { %v1580_v14 = vadd.f32 %v1548_v60, %v1505_v48 }
 0x434   :  { %v1507_v2 = vpop.f32.mrf.mxu1 }
 0x435   :  { %v1581_v11 = vadd.f32 %v1549_v45, %v1507_v2  ;;  %v1598_v33 = vpack.c.bf16 %v1580_v14, %v1578_v3  ;;  %v3423_v14 = vld [vmem:[%s3506_s7 + $0x20] sm:$0xff] }
 0x436   :  { %v1511_v9 = vpop.f32.mrf.mxu1 }
 0x437   :  { %v1599_v12 = vpack.c.bf16 %v1581_v11, %v1579_v56  ;;  %v1582_v62 = vadd.f32 %v1550_v34, %v1511_v9  ;;  %v3429_v9 = vld [vmem:[%s3507_s8 + $0x20] sm:$0xff]  ;;  %v3442_v34 = vld [vmem:[%s3507_s8 + $0x28] sm:$0xff] }
 0x438   :  { %v1513_v13 = vpop.f32.mrf.mxu1 }
 0x439   :  { %1817 = vmatprep.mubr.bf16.mxu1 %v1599_v12  ;;  %v1583_v53 = vadd.f32 %v1551_v27, %v1513_v13 }
 0x43a   :  { %v1517_v51 = vpop.f32.mrf.mxu1  ;;  %1818 = vmatmul.mubr.bf16.gmra.mxu1 %v1598_v33 }
 0x43b   :  { %v1584_v35 = vadd.f32 %v1552_v23, %v1517_v51 }
 0x43c   :  { %v1519_v38 = vpop.f32.mrf.mxu1 }
 0x43d   :  { %v1585_v28 = vadd.f32 %v1553_v16, %v1519_v38  ;;  %v1600_v58 = vpack.c.bf16 %v1584_v35, %v1582_v62 }
 0x43f   :  { %v1601_v40 = vpack.c.bf16 %v1585_v28, %v1583_v53  ;;  %v3449_v53 = vld [vmem:[%s3506_s7 + $0x30] sm:$0xff] }
 0x441   :  { %1825 = vmatprep.mubr.bf16.mxu1 %v1601_v40 }
 0x442   :  { %1826 = vmatmul.mubr.bf16.gmra.mxu1 %v1600_v58 }
 0x4ca   :  { %v2123_v21 = vpop.f32.mrf.mxu1 }
 0x4cc   :  { %v2124_v52 = vpop.f32.mrf.mxu1 }
 0x4cd   :  { %v2125_v59 = vadd.f32 %v2124_v52, %v2123_v21  ;;  %v3455_v21 = vld [vmem:[%s3507_s8 + $0x30] sm:$0xff] }
 0x4ce   :  { %v2126_v46 = vpop.f32.mrf.mxu1 }
 0x4cf   :  { %v1772_v25 = vadd.f32 %v2125_v59, %v3366_v18 }
 0x4d0   :  { %v2127_v24 = vpop.f32.mrf.mxu1 }
 0x4d1   :  { %v1834_v22 = vmax.f32 %v1772_v25, 0.0  ;;  %v2128_v43 = vadd.f32 %v2127_v24, %v2126_v46  ;;  %v3462_v25 = vld [vmem:[%s3506_s7 + $0x38] sm:$0xff]  ;;  %s2478_s7 = smov [#allocation2]  }
 0x4d2   :  { %v2129_v15 = vpop.f32.mrf.mxu1 }
 0x4d3   :  { %v1866_v36 = vmul.f32 %v3372_v55, %v1834_v22  ;;  %v1775_v8 = vadd.f32 %v2128_v43, %v3366_v18 }
 0x4d4   :  { %v2130_v50 = vpop.f32.mrf.mxu1 }
 0x4d5   :  { %v1874_v54 = vadd.f32 %v1866_v36, %v3377_v31  ;;  %v1835_v26 = vmax.f32 %v1775_v8, 0.0  ;;  %v2131_v49 = vadd.f32 %v2130_v50, %v2129_v15  ;;  %v3468_v36 = vld [vmem:[%s3507_s8 + $0x38] sm:$0xff]  ;;  %s1919_s8 = sshll.u32 %s2478_s7, 4  ;;  %s1920_s8 = int_to_ptr.vmem [resolvable:$true] %s1919_s8 }
 0x4d6   :  { %v2132_v5 = vpop.f32.mrf.mxu1  ;;  %s2455_s6 = scalar_lea.vmem %s1920_s8, 2048  ;;  %p2460_p1 = scmp.lt.s32.totalorder %s1920_s8, %s1920_s8 }
 0x4d7   :  { %1882 = vst [vmem:[#allocation2] sm:$0xff] %v1874_v54  ;;  %v1867_v20 = vmul.f32 %v3384_v63, %v1835_v26  ;;  %v1780_v41 = vadd.f32 %v2131_v49, %v3366_v18  ;;  %p2456_p0 = scmp.ne.s32.totalorder %s1920_s8, %s2455_s6  ;;  %p2461_p2 = scmp.lt.s32.totalorder %s2455_s6, %s2455_s6 }
 0x4d8   :  { %v2133_v37 = vpop.f32.mrf.mxu1 }
 0x4d9   :  { %v1875_v47 = vadd.f32 %v1867_v20, %v3390_v42  ;;  %v1836_v30 = vmax.f32 %v1780_v41, 0.0  ;;  %v2134_v39 = vadd.f32 %v2133_v37, %v2132_v5  ;;  %p2462_p3 = por %p2461_p2, %p2460_p1 }
 0x4da   :  { %v2135_v29 = vpop.f32.mrf.mxu1 }
 0x4db   :  { %1883 = vst [vmem:[#allocation2 + $0x8] sm:$0xff] %v1875_v47  ;;  %v1868_v6 = vmul.f32 %v3397_v1, %v1836_v30  ;;  %v1783_v7 = vadd.f32 %v2134_v39, %v3366_v18  ;;  %p2463_p4 = pnand %p2462_p3, %p2456_p0 }
 0x4dc   :  { %v2136_v4 = vpop.f32.mrf.mxu1 }
 0x4dd   :  { %v1876_v44 = vadd.f32 %v1868_v6, %v3403_v19  ;;  %v1837_v60 = vmax.f32 %v1783_v7, 0.0  ;;  %v2137_v10 = vadd.f32 %v2136_v4, %v2135_v29 }
 0x4de   :  { %v2138_v45 = vpop.f32.mrf.mxu1 }
 0x4df   :  { %1884 = vst [vmem:[#allocation2 + $0x10] sm:$0xff] %v1876_v44  ;;  %v1869_v61 = vmul.f32 %v3410_v32, %v1837_v60  ;;  %v1788_v48 = vadd.f32 %v2137_v10, %v3366_v18 }
 0x4e0   :  { %v2139_v2 = vpop.f32.mrf.mxu1 }
 0x4e1   :  { %v1877_v56 = vadd.f32 %v1869_v61, %v3416_v57  ;;  %v1838_v11 = vmax.f32 %v1788_v48, 0.0  ;;  %v2140_v3 = vadd.f32 %v2139_v2, %v2138_v45 }
 0x4e2   :  { %v2141_v12 = vpop.f32.mrf.mxu1 }
 0x4e3   :  { %1885 = vst [vmem:[#allocation2 + $0x18] sm:$0xff] %v1877_v56  ;;  %v1870_v33 = vmul.f32 %v3423_v14, %v1838_v11  ;;  %v1791_v13 = vadd.f32 %v2140_v3, %v3366_v18 }
 0x4e4   :  { %v2142_v23 = vpop.f32.mrf.mxu1 }
 0x4e5   :  { %v1878_v0 = vadd.f32 %v1870_v33, %v3429_v9  ;;  %v1839_v27 = vmax.f32 %v1791_v13, 0.0  ;;  %v2143_v16 = vadd.f32 %v2142_v23, %v2141_v12 }
 0x4e6   :  { %v2144_v51 = vpop.f32.mrf.mxu1 }
 0x4e7   :  { %1886 = vst [vmem:[#allocation2 + $0x20] sm:$0xff] %v1878_v0  ;;  %v1871_v35 = vmul.f32 %v3436_v17, %v1839_v27  ;;  %v1796_v38 = vadd.f32 %v2143_v16, %v3366_v18 }
 0x4e8   :  { %v2145_v28 = vpop.f32.mrf.mxu1 }
 0x4e9   :  { %v1879_v62 = vadd.f32 %v1871_v35, %v3442_v34  ;;  %v1840_v40 = vmax.f32 %v1796_v38, 0.0  ;;  %v2146_v58 = vadd.f32 %v2145_v28, %v2144_v51 }
 0x4ea   :  { %v2147_v52 = vpop.f32.mrf.mxu1 }
 0x4eb   :  { %1887 = vst [vmem:[#allocation2 + $0x28] sm:$0xff] %v1879_v62  ;;  %v1872_v59 = vmul.f32 %v3449_v53, %v1840_v40  ;;  %v1799_v46 = vadd.f32 %v2146_v58, %v3366_v18 }
 0x4ec   :  { %v2148_v24 = vpop.f32.mrf.mxu1 }
 0x4ed   :  { %v1880_v22 = vadd.f32 %v1872_v59, %v3455_v21  ;;  %v1841_v43 = vmax.f32 %v1799_v46, 0.0  ;;  %v2149_v15 = vadd.f32 %v2148_v24, %v2147_v52 }
 0x4ee   :  { %v2150_v8 = vpop.f32.mrf.mxu1 }
 0x4ef   :  { %1888 = vst [vmem:[#allocation2 + $0x30] sm:$0xff] %v1880_v22  ;;  %v1873_v50 = vmul.f32 %v3462_v25, %v1841_v43  ;;  %v1804_v54 = vadd.f32 %v2149_v15, %v3366_v18 }
 0x4f0   :  { %v2151_v26 = vpop.f32.mrf.mxu1 }
 0x4f1   :  { %v1881_v49 = vadd.f32 %v1873_v50, %v3468_v36  ;;  %v1842_v5 = vmax.f32 %v1804_v54, 0.0  ;;  %v2152_v20 = vadd.f32 %v2151_v26, %v2150_v8 }
 0x4f2   :  { %v2153_v41 = vpop.f32.mrf.mxu1 }
 0x4f3   :  { %1889 = vst [vmem:[#allocation2 + $0x38] sm:$0xff] %v1881_v49  ;;  %v1890_v37 = vmul.f32 %v3372_v55, %v1842_v5  ;;  %v1807_v47 = vadd.f32 %v2152_v20, %v3366_v18 }
 0x4f4   :  { %v2154_v30 = vpop.f32.mrf.mxu1 }
 0x4f5   :  { %v1898_v39 = vadd.f32 %v1890_v37, %v3377_v31  ;;  %v1843_v29 = vmax.f32 %v1807_v47, 0.0  ;;  %v2155_v6 = vadd.f32 %v2154_v30, %v2153_v41 }
 0x4f6   :  { %v2156_v7 = vpop.f32.mrf.mxu1 }
 0x4f7   :  { %1906 = vst [vmem:[#allocation2 + $0x40] sm:$0xff] %v1898_v39  ;;  %v1891_v4 = vmul.f32 %v3384_v63, %v1843_v29  ;;  %v1812_v44 = vadd.f32 %v2155_v6, %v3366_v18 }
 0x4f8   :  { %v2157_v60 = vpop.f32.mrf.mxu1 }
 0x4f9   :  { %v1899_v10 = vadd.f32 %v1891_v4, %v3390_v42  ;;  %v1844_v45 = vmax.f32 %v1812_v44, 0.0  ;;  %v2158_v61 = vadd.f32 %v2157_v60, %v2156_v7 }
 0x4fa   :  { %v2159_v48 = vpop.f32.mrf.mxu1 }
 0x4fb   :  { %1907 = vst [vmem:[#allocation2 + $0x48] sm:$0xff] %v1899_v10  ;;  %v1892_v55 = vmul.f32 %v3397_v1, %v1844_v45  ;;  %v1815_v2 = vadd.f32 %v2158_v61, %v3366_v18 }
 0x4fc   :  { %v2160_v31 = vpop.f32.mrf.mxu1 }
 0x4fd   :  { %v1900_v56 = vadd.f32 %v1892_v55, %v3403_v19  ;;  %v1845_v11 = vmax.f32 %v1815_v2, 0.0  ;;  %v2161_v3 = vadd.f32 %v2160_v31, %v2159_v48 }
 0x4fe   :  { %v2162_v12 = vpop.f32.mrf.mxu1 }
 0x4ff   :  { %1908 = vst [vmem:[#allocation2 + $0x50] sm:$0xff] %v1900_v56  ;;  %v1893_v63 = vmul.f32 %v3410_v32, %v1845_v11  ;;  %v1820_v33 = vadd.f32 %v2161_v3, %v3366_v18 }
 0x500   :  { %v2163_v42 = vpop.f32.mrf.mxu1 }
 0x501   :  { %v1901_v13 = vadd.f32 %v1893_v63, %v3416_v57  ;;  %v1846_v23 = vmax.f32 %v1820_v33, 0.0  ;;  %v2164_v0 = vadd.f32 %v2163_v42, %v2162_v12 }
 0x502   :  { %v2165_v27 = vpop.f32.mrf.mxu1 }
 0x503   :  { %1909 = vst [vmem:[#allocation2 + $0x58] sm:$0xff] %v1901_v13  ;;  %v1894_v1 = vmul.f32 %v3423_v14, %v1846_v23  ;;  %v1823_v16 = vadd.f32 %v2164_v0, %v3366_v18 }
 0x504   :  { %v2166_v19 = vpop.f32.mrf.mxu1 }
 0x505   :  { %v1902_v51 = vadd.f32 %v1894_v1, %v3429_v9  ;;  %v1847_v35 = vmax.f32 %v1823_v16, 0.0  ;;  %v2167_v38 = vadd.f32 %v2166_v19, %v2165_v27 }
 0x506   :  { %v2168_v28 = vpop.f32.mrf.mxu1 }
 0x507   :  { %1910 = vst [vmem:[#allocation2 + $0x60] sm:$0xff] %v1902_v51  ;;  %v1895_v32 = vmul.f32 %v3436_v17, %v1847_v35  ;;  %v1828_v62 = vadd.f32 %v2167_v38, %v3366_v18 }
 0x508   :  { %v2169_v57 = vpop.f32.mrf.mxu1 }
 0x509   :  { %v1903_v40 = vadd.f32 %v1895_v32, %v3442_v34  ;;  %v1848_v58 = vmax.f32 %v1828_v62, 0.0  ;;  %v2170_v52 = vadd.f32 %v2169_v57, %v2168_v28 }
 0x50b   :  { %1911 = vst [vmem:[#allocation2 + $0x68] sm:$0xff] %v1903_v40  ;;  %v1896_v14 = vmul.f32 %v3449_v53, %v1848_v58  ;;  %v1831_v59 = vadd.f32 %v2170_v52, %v3366_v18 }
 0x50d   :  { %v1904_v9 = vadd.f32 %v1896_v14, %v3455_v21  ;;  %v1849_v46 = vmax.f32 %v1831_v59, 0.0 }
 0x50f   :  { %1912 = vst [vmem:[#allocation2 + $0x70] sm:$0xff] %v1904_v9  ;;  %v1897_v17 = vmul.f32 %v3462_v25, %v1849_v46 }
 0x511   :  { %v1905_v24 = vadd.f32 %v1897_v17, %v3468_v36 }
 0x513   :  { %1913 = vst [vmem:[#allocation2 + $0x78] sm:$0xff] %v1905_v24 }
 0x514   :  { %2466 = shalt.err (!%p2463_p4)
}
 0x515   :  { %s2479_s12 = smov 128   ;;  %s2480_s13 = smov 8  }
 0x516   :  { %1925 = dma.vmem_to_hbm [thread:$0]  %s1920_s8, 2048, %s3508_s9, [#allocation3], %s2479_s12, %s2479_s12, %s2480_s13  }
 0x517   :  { %2475 = dma.done.wait [#allocation3], 2048  }
 0x518   :  { %2476 = vsyncadd [#allocation3], 4294965248 }
 0x519   :  { %1929 = vsyncpa [#allocation3], 1 }

</bundles_post_ra>
